<compile_context>
chip_gen: v6e
topology: v6e:2x2x1
jax: 0.10.0
libtpu: 0.0.40
codegen_flags: <defaults>
</compile_context>

<pallas_src>
import jax
import jax.numpy as jnp
from jax.experimental import pallas as pl
from jax.experimental.pallas import tpu as pltpu

# ------------------------- model hyper-parameters ---------------------------
B = 2              # batch
T = 16             # input sequence length
CIN = 4            # input_channels
COUT = 64          # conv_channels
K = 5              # conv kernel size (padding=2)
H = 128            # lstm_hidden
NC = 10            # num_classes
TP = T // 2        # sequence length after MaxPool1d(2)
BN_EPS = 1e-5

KCIN = K * CIN     # im2col patch width (=20); layout is k-major (k*CIN + ci)
NCP = 128          # num_classes padded up to a full 128-lane vreg


# ------------------------------ Pallas kernel -------------------------------
def cnn_lstm_kernel(x_ref, wconv_ref, shift_ref, wih_ref, blstm_ref,
                    whh_hbm_ref, wfc_hbm_ref, bfc_ref,
                    out_ref,
                    whh_vmem, wfc_vmem, dma_sem):
    """Fused Conv1d + BN(folded) + ReLU + MaxPool + LSTM + FC.

    Gate layout (columns of wih/whh/blstm): i, f, o, g; the i/f/o columns are
    pre-scaled by 0.5 at prep time so sigmoid(a) == 0.5*tanh(col) + 0.5.
    """
    # ---- start recurrence/FC weight DMAs; overlap with the up-front matmuls
    whh_cp = pltpu.make_async_copy(whh_hbm_ref, whh_vmem, dma_sem.at[0])
    wfc_cp = pltpu.make_async_copy(wfc_hbm_ref, wfc_vmem, dma_sem.at[1])
    whh_cp.start()
    wfc_cp.start()

    # ---- in-kernel im2col (Conv1d, kernel=5, padding=2) --------------------
    x = x_ref[...]                                            # (B, T, CIN)
    zpad = jnp.zeros((B, 2, CIN), jnp.float32)
    x_pad = jnp.concatenate([zpad, x, zpad], axis=1)          # (B, T+4, CIN)
    patches = jnp.concatenate(
        [x_pad[:, k:k + T, :] for k in range(K)], axis=-1)    # (B, T, K*CIN)
    patches = patches.reshape(B * T, KCIN)                    # row = b*T + t

    # ---- Conv1d + BatchNorm (scale folded into wconv) + ReLU ---------------
    act = jnp.maximum(
        jnp.dot(patches, wconv_ref[...], preferred_element_type=jnp.float32)
        + shift_ref[...],
        0.0)                                                  # (B*T, COUT)

    # ---- MaxPool1d(kernel_size=2) over time --------------------------------
    pooled = jnp.max(act.reshape(B, TP, 2, COUT), axis=2)     # (B, TP, COUT)
    # time-major rows (row = t*B + b) so each step reads a contiguous slice
    xt_all = jnp.transpose(pooled, (1, 0, 2)).reshape(TP * B, COUT)

    # ---- input contribution to the gates for every timestep (one matmul) ---
    gates_x = (jnp.dot(xt_all, wih_ref[...],
                       preferred_element_type=jnp.float32)
               + blstm_ref[...])                              # (TP*B, 4H)

    # ---- LSTM recurrence ----------------------------------------------------
    whh_cp.wait()
    whh = whh_vmem[...]                                       # hoisted RHS load

    h = jnp.zeros((B, H), jnp.float32)
    c = jnp.zeros((B, H), jnp.float32)

    for t in range(TP):
        gates = (gates_x[t * B:(t + 1) * B]
                 + jnp.dot(h, whh, preferred_element_type=jnp.float32))  # (B,4H)
        # pack the 4 gate slabs onto the sublane axis -> one full (8,128) vreg
        packed = jnp.concatenate(
            [gates[:, 0 * H:1 * H], gates[:, 1 * H:2 * H],
             gates[:, 2 * H:3 * H], gates[:, 3 * H:4 * H]], axis=0)      # (4B,H)
        th = jnp.tanh(packed)          # single EUP push for i, f, o and g
        aff = th * 0.5 + 0.5           # valid for the i/f/o rows (pre-scaled)
        i_g = aff[0 * B:1 * B]
        f_g = aff[1 * B:2 * B]
        o_g = aff[2 * B:3 * B]
        g_g = th[3 * B:4 * B]
        c = f_g * c + i_g * g_g
        h = o_g * jnp.tanh(c)

    # ---- final Linear on the last hidden state (lstm_out[:, -1, :]) --------
    wfc_cp.wait()
    out_ref[...] = (jnp.dot(h, wfc_vmem[...],
                            preferred_element_type=jnp.float32)
                    + bfc_ref[...]).astype(out_ref.dtype)


# ------------------------- one-time parameter prep --------------------------
def prep_params(p):
    """Fold BN into the conv weight, reorder LSTM gates to (i,f,o,g),
    pre-scale i/f/o columns by 0.5 (tanh-sigmoid form), transpose & pad."""
    # TODO(synk): training-mode BatchNorm (batch statistics) not implemented;
    #             inference-mode running stats are folded into the conv weight.
    inv_std = 1.0 / jnp.sqrt(p["bn_var"] + BN_EPS)
    scale = p["bn_gamma"] * inv_std                                  # (COUT,)
    shift = ((p["conv_b"] - p["bn_mean"]) * scale
             + p["bn_beta"]).reshape(1, COUT)

    # k-major patch layout (k*CIN + ci) to match the in-kernel im2col concat
    wconv = p["conv_w"].transpose(0, 2, 1).reshape(COUT, KCIN).T     # (KCIN,COUT)
    wconv = wconv * scale[None, :]                                   # fold BN scale

    def reorder_rows(w):   # PyTorch gate order i,f,g,o  ->  i,f,o,g
        return jnp.concatenate([w[:2 * H], w[3 * H:], w[2 * H:3 * H]], axis=0)

    # 0.5 pre-scale of i/f/o columns: sigmoid(a) = 0.5*tanh(0.5*a) + 0.5
    gate_scale = jnp.concatenate(
        [jnp.full((3 * H,), 0.5, jnp.float32), jnp.ones((H,), jnp.float32)])

    wih_t = reorder_rows(p["w_ih"]).T * gate_scale[None, :]          # (COUT, 4H)
    whh_t = reorder_rows(p["w_hh"]).T * gate_scale[None, :]          # (H, 4H)
    b = p["b_ih"] + p["b_hh"]
    blstm = (jnp.concatenate([b[:2 * H], b[3 * H:], b[2 * H:3 * H]])
             * gate_scale).reshape(1, 4 * H)

    wfc_t = jnp.pad(p["fc_w"].T, ((0, 0), (0, NCP - NC)))            # (H, NCP)
    bfc = jnp.pad(p["fc_b"], (0, NCP - NC)).reshape(1, NCP)          # (1, NCP)

    return {"wconv": wconv, "shift": shift,
            "wih": wih_t, "whh": whh_t, "blstm": blstm,
            "wfc": wfc_t, "bfc": bfc}


# ------------------------------ host wrapper --------------------------------
@jax.jit
def cnn_lstm_forward(x, w):
    """x: (B, T, CIN) float32, w: prepped params -> (B, NC) float32."""
    vmem = pl.BlockSpec(memory_space=pltpu.MemorySpace.VMEM)
    hbm = pl.BlockSpec(memory_space=pl.ANY)      # DMA'd manually inside kernel
    out = pl.pallas_call(
        cnn_lstm_kernel,
        out_shape=jax.ShapeDtypeStruct((B, NCP), jnp.float32),
        in_specs=[vmem,   # x
                  vmem,   # wconv (BN-folded)
                  vmem,   # shift
                  vmem,   # wih
                  vmem,   # blstm
                  hbm,    # whh  (manual async copy)
                  hbm,    # wfc  (manual async copy)
                  vmem],  # bfc
        out_specs=vmem,
        scratch_shapes=[pltpu.VMEM((H, 4 * H), jnp.float32),   # whh buffer
                        pltpu.VMEM((H, NCP), jnp.float32),     # wfc buffer
                        pltpu.SemaphoreType.DMA((2,))],
    )(x, w["wconv"], w["shift"], w["wih"], w["blstm"],
      w["whh"], w["wfc"], w["bfc"])
    return out[:, :NC]


# --------------------------- pure-JAX reference ------------------------------
def reference_forward(x, p):
    xc = jnp.transpose(x, (0, 2, 1))                             # (B, Cin, T)
    y = jax.lax.conv_general_dilated(
        xc, p["conv_w"], window_strides=(1,), padding=((2, 2),),
        dimension_numbers=("NCH", "OIH", "NCH"))
    y = y + p["conv_b"][None, :, None]
    y = ((y - p["bn_mean"][None, :, None])
         / jnp.sqrt(p["bn_var"][None, :, None] + BN_EPS)
         * p["bn_gamma"][None, :, None] + p["bn_beta"][None, :, None])
    y = jnp.maximum(y, 0.0)
    y = jnp.max(y.reshape(B, COUT, TP, 2), axis=-1)              # MaxPool1d(2)
    y = jnp.transpose(y, (0, 2, 1))                              # (B, Tp, Cout)
    h = jnp.zeros((B, H)); c = jnp.zeros((B, H))
    for t in range(TP):
        xt = y[:, t, :]
        gates = xt @ p["w_ih"].T + h @ p["w_hh"].T + p["b_ih"] + p["b_hh"]
        i_g = jax.nn.sigmoid(gates[:, :H])
        f_g = jax.nn.sigmoid(gates[:, H:2 * H])
        g_g = jnp.tanh(gates[:, 2 * H:3 * H])
        o_g = jax.nn.sigmoid(gates[:, 3 * H:])
        c = f_g * c + i_g * g_g
        h = o_g * jnp.tanh(c)
    return h @ p["fc_w"].T + p["fc_b"]


# ------------------------------- parameters ---------------------------------
def init_params(key):
    ks = jax.random.split(key, 12)
    u = lambda k, shape, s: jax.random.uniform(k, shape, jnp.float32, -s, s)
    k_lstm = 1.0 / jnp.sqrt(H)
    return {
        "conv_w": u(ks[0], (COUT, CIN, K), 1.0 / jnp.sqrt(CIN * K)),
        "conv_b": u(ks[1], (COUT,), 1.0 / jnp.sqrt(CIN * K)),
        "bn_gamma": 1.0 + 0.1 * jax.random.normal(ks[2], (COUT,), jnp.float32),
        "bn_beta": 0.1 * jax.random.normal(ks[3], (COUT,), jnp.float32),
        "bn_mean": 0.1 * jax.random.normal(ks[4], (COUT,), jnp.float32),
        "bn_var": 1.0 + jnp.abs(0.1 * jax.random.normal(ks[5], (COUT,), jnp.float32)),
        "w_ih": u(ks[6], (4 * H, COUT), k_lstm),
        "w_hh": u(ks[7], (4 * H, H), k_lstm),
        "b_ih": u(ks[8], (4 * H,), k_lstm),
        "b_hh": u(ks[9], (4 * H,), k_lstm),
        "fc_w": u(ks[10], (NC, H), 1.0 / jnp.sqrt(H)),
        "fc_b": u(ks[11], (NC,), 1.0 / jnp.sqrt(H)),
    }


if __name__ == "__main__":
    key = jax.random.PRNGKey(0)
    k_x, k_p = jax.random.split(key)
    x = jax.random.normal(k_x, (B, T, CIN), jnp.float32)
    params = init_params(k_p)

    # One-time weight preparation (outside the per-call forward path).
    prepped = jax.tree_util.tree_map(jax.block_until_ready, prep_params(params))

    out = jax.block_until_ready(cnn_lstm_forward(x, prepped))
    ref = jax.block_until_ready(reference_forward(x, params))

    assert out.shape == (B, NC), out.shape
    assert jnp.allclose(out, ref, atol=1e-3, rtol=1e-3), (
        f"max abs diff {jnp.max(jnp.abs(out - ref))}")
    print("KERNEL_OK")
</pallas_src>

<mosaic_0001>
module attributes {stable_mosaic.version = 11 : i64} {
  func.func @cnn_lstm_kernel(%arg0: memref<2x16x4xf32, #tpu.memory_space<vmem>>, %arg1: memref<20x64xf32, #tpu.memory_space<vmem>>, %arg2: memref<1x64xf32, #tpu.memory_space<vmem>>, %arg3: memref<64x512xf32, #tpu.memory_space<vmem>>, %arg4: memref<1x512xf32, #tpu.memory_space<vmem>>, %arg5: memref<128x512xf32, #tpu.memory_space<any>>, %arg6: memref<128x128xf32, #tpu.memory_space<any>>, %arg7: memref<1x128xf32, #tpu.memory_space<vmem>>, %arg8: memref<2x128xf32, #tpu.memory_space<vmem>>, %arg9: memref<128x512xf32, #tpu.memory_space<vmem>>, %arg10: memref<128x128xf32, #tpu.memory_space<vmem>>, %arg11: memref<2x!tpu.dma_semaphore, #tpu.memory_space<semaphore_mem>>) attributes {dimension_semantics = [], scalar_prefetch = 0 : i64, scratch_operands = 3 : i64, tpu.core_type = #tpu.core_type<tc>} {
    %c0_i32 = arith.constant 0 : i32
    %0 = tpu.memref_slice %arg11[%c0_i32] : memref<2x!tpu.dma_semaphore, #tpu.memory_space<semaphore_mem>> -> memref<1x!tpu.dma_semaphore, #tpu.memory_space<semaphore_mem>>
    %1 = tpu.memref_squeeze %0 : memref<1x!tpu.dma_semaphore, #tpu.memory_space<semaphore_mem>> -> memref<!tpu.dma_semaphore, #tpu.memory_space<semaphore_mem>>
    tpu.enqueue_dma source(%arg5 : memref<128x512xf32, #tpu.memory_space<any>>) target(%arg9 : memref<128x512xf32, #tpu.memory_space<vmem>>) target_semaphore(%1 : memref<!tpu.dma_semaphore, #tpu.memory_space<semaphore_mem>>)
    %c1_i32 = arith.constant 1 : i32
    %2 = tpu.memref_slice %arg11[%c1_i32] : memref<2x!tpu.dma_semaphore, #tpu.memory_space<semaphore_mem>> -> memref<1x!tpu.dma_semaphore, #tpu.memory_space<semaphore_mem>>
    %3 = tpu.memref_squeeze %2 : memref<1x!tpu.dma_semaphore, #tpu.memory_space<semaphore_mem>> -> memref<!tpu.dma_semaphore, #tpu.memory_space<semaphore_mem>>
    tpu.enqueue_dma source(%arg6 : memref<128x128xf32, #tpu.memory_space<any>>) target(%arg10 : memref<128x128xf32, #tpu.memory_space<vmem>>) target_semaphore(%3 : memref<!tpu.dma_semaphore, #tpu.memory_space<semaphore_mem>>)
    %c0 = arith.constant 0 : index
    %c0_0 = arith.constant 0 : index
    %c0_1 = arith.constant 0 : index
    %4 = vector.load %arg0[%c0, %c0_0, %c0_1] : memref<2x16x4xf32, #tpu.memory_space<vmem>>, vector<2x16x4xf32>
    %cst = arith.constant 0.000000e+00 : f32
    %5 = vector.broadcast %cst : f32 to vector<2x2x4xf32>
    %6 = tpu.concatenate %5, %4, %5 in 1 : vector<2x2x4xf32>, vector<2x16x4xf32>, vector<2x2x4xf32> -> vector<2x20x4xf32>
    %7 = vector.extract_strided_slice %6 {offsets = [0, 0, 0], sizes = [2, 16, 4], strides = [1, 1, 1]} : vector<2x20x4xf32> to vector<2x16x4xf32>
    %8 = vector.extract_strided_slice %6 {offsets = [0, 1, 0], sizes = [2, 16, 4], strides = [1, 1, 1]} : vector<2x20x4xf32> to vector<2x16x4xf32>
    %9 = vector.extract_strided_slice %6 {offsets = [0, 2, 0], sizes = [2, 16, 4], strides = [1, 1, 1]} : vector<2x20x4xf32> to vector<2x16x4xf32>
    %10 = vector.extract_strided_slice %6 {offsets = [0, 3, 0], sizes = [2, 16, 4], strides = [1, 1, 1]} : vector<2x20x4xf32> to vector<2x16x4xf32>
    %11 = vector.extract_strided_slice %6 {offsets = [0, 4, 0], sizes = [2, 16, 4], strides = [1, 1, 1]} : vector<2x20x4xf32> to vector<2x16x4xf32>
    %12 = tpu.concatenate %7, %8, %9, %10, %11 in 2 : vector<2x16x4xf32>, vector<2x16x4xf32>, vector<2x16x4xf32>, vector<2x16x4xf32>, vector<2x16x4xf32> -> vector<2x16x20xf32>
    %13 = vector.shape_cast %12 : vector<2x16x20xf32> to vector<32x20xf32>
    %c0_2 = arith.constant 0 : index
    %c0_3 = arith.constant 0 : index
    %14 = vector.load %arg1[%c0_2, %c0_3] : memref<20x64xf32, #tpu.memory_space<vmem>>, vector<20x64xf32>
    %cst_4 = arith.constant dense<0.000000e+00> : vector<32x64xf32>
    %15 = tpu.matmul %13, %14, %cst_4 {dimension_numbers = #tpu.dot_dimension_numbers<[1], [0], [0], [1], [0, 0, 1, 1], [], []>} : vector<32x20xf32>, vector<20x64xf32>, vector<32x64xf32> -> vector<32x64xf32>
    %c0_5 = arith.constant 0 : index
    %c0_6 = arith.constant 0 : index
    %16 = vector.load %arg2[%c0_5, %c0_6] : memref<1x64xf32, #tpu.memory_space<vmem>>, vector<1x64xf32>
    %17 = vector.broadcast %16 : vector<1x64xf32> to vector<32x64xf32>
    %18 = arith.addf %15, %17 : vector<32x64xf32>
    %cst_7 = arith.constant 0.000000e+00 : f32
    %19 = vector.broadcast %cst_7 : f32 to vector<32x64xf32>
    %20 = arith.maximumf %18, %19 : vector<32x64xf32>
    %21 = vector.shape_cast %20 : vector<32x64xf32> to vector<2x8x2x64xf32>
    %cst_8 = arith.constant dense<0xFF800000> : vector<2x8x64xf32>
    %22 = vector.multi_reduction <maximumf>, %21, %cst_8 [2] : vector<2x8x2x64xf32> to vector<2x8x64xf32>
    %23 = tpu.transpose %22, [1, 0, 2] : vector<2x8x64xf32> -> vector<8x2x64xf32>
    %24 = vector.shape_cast %23 : vector<8x2x64xf32> to vector<16x64xf32>
    %c0_9 = arith.constant 0 : index
    %c0_10 = arith.constant 0 : index
    %25 = vector.load %arg3[%c0_9, %c0_10] : memref<64x512xf32, #tpu.memory_space<vmem>>, vector<64x512xf32>
    %cst_11 = arith.constant dense<0.000000e+00> : vector<16x512xf32>
    %26 = tpu.matmul %24, %25, %cst_11 {dimension_numbers = #tpu.dot_dimension_numbers<[1], [0], [0], [1], [0, 0, 1, 1], [], []>} : vector<16x64xf32>, vector<64x512xf32>, vector<16x512xf32> -> vector<16x512xf32>
    %c0_12 = arith.constant 0 : index
    %c0_13 = arith.constant 0 : index
    %27 = vector.load %arg4[%c0_12, %c0_13] : memref<1x512xf32, #tpu.memory_space<vmem>>, vector<1x512xf32>
    %28 = vector.broadcast %27 : vector<1x512xf32> to vector<16x512xf32>
    %29 = arith.addf %26, %28 : vector<16x512xf32>
    %c0_i32_14 = arith.constant 0 : i32
    %30 = tpu.memref_slice %arg11[%c0_i32_14] : memref<2x!tpu.dma_semaphore, #tpu.memory_space<semaphore_mem>> -> memref<1x!tpu.dma_semaphore, #tpu.memory_space<semaphore_mem>>
    %31 = tpu.memref_squeeze %30 : memref<1x!tpu.dma_semaphore, #tpu.memory_space<semaphore_mem>> -> memref<!tpu.dma_semaphore, #tpu.memory_space<semaphore_mem>>
    tpu.wait_dma2 semaphore(%31 : memref<!tpu.dma_semaphore, #tpu.memory_space<semaphore_mem>>) src(%arg5 : memref<128x512xf32, #tpu.memory_space<any>>) dst(%arg9 : memref<128x512xf32, #tpu.memory_space<vmem>>)
    %c0_15 = arith.constant 0 : index
    %c0_16 = arith.constant 0 : index
    %32 = vector.load %arg9[%c0_15, %c0_16] : memref<128x512xf32, #tpu.memory_space<vmem>>, vector<128x512xf32>
    %cst_17 = arith.constant 0.000000e+00 : f32
    %33 = vector.broadcast %cst_17 : f32 to vector<2x128xf32>
    %cst_18 = arith.constant 0.000000e+00 : f32
    %34 = vector.broadcast %cst_18 : f32 to vector<2x128xf32>
    %35 = vector.extract_strided_slice %29 {offsets = [0, 0], sizes = [2, 512], strides = [1, 1]} : vector<16x512xf32> to vector<2x512xf32>
    %cst_19 = arith.constant dense<0.000000e+00> : vector<2x512xf32>
    %36 = tpu.matmul %33, %32, %cst_19 {dimension_numbers = #tpu.dot_dimension_numbers<[1], [0], [0], [1], [0, 0, 1, 1], [], []>} : vector<2x128xf32>, vector<128x512xf32>, vector<2x512xf32> -> vector<2x512xf32>
    %37 = arith.addf %35, %36 : vector<2x512xf32>
    %38 = vector.extract_strided_slice %37 {offsets = [0, 0], sizes = [2, 128], strides = [1, 1]} : vector<2x512xf32> to vector<2x128xf32>
    %39 = vector.extract_strided_slice %37 {offsets = [0, 128], sizes = [2, 128], strides = [1, 1]} : vector<2x512xf32> to vector<2x128xf32>
    %40 = vector.extract_strided_slice %37 {offsets = [0, 256], sizes = [2, 128], strides = [1, 1]} : vector<2x512xf32> to vector<2x128xf32>
    %41 = vector.extract_strided_slice %37 {offsets = [0, 384], sizes = [2, 128], strides = [1, 1]} : vector<2x512xf32> to vector<2x128xf32>
    %42 = tpu.concatenate %38, %39, %40, %41 in 0 : vector<2x128xf32>, vector<2x128xf32>, vector<2x128xf32>, vector<2x128xf32> -> vector<8x128xf32>
    %43 = math.tanh %42 : vector<8x128xf32>
    %cst_20 = arith.constant 5.000000e-01 : f32
    %44 = vector.broadcast %cst_20 : f32 to vector<8x128xf32>
    %45 = arith.mulf %43, %44 : vector<8x128xf32>
    %cst_21 = arith.constant 5.000000e-01 : f32
    %46 = vector.broadcast %cst_21 : f32 to vector<8x128xf32>
    %47 = arith.addf %45, %46 : vector<8x128xf32>
    %48 = vector.extract_strided_slice %47 {offsets = [0, 0], sizes = [2, 128], strides = [1, 1]} : vector<8x128xf32> to vector<2x128xf32>
    %49 = vector.extract_strided_slice %47 {offsets = [2, 0], sizes = [2, 128], strides = [1, 1]} : vector<8x128xf32> to vector<2x128xf32>
    %50 = vector.extract_strided_slice %47 {offsets = [4, 0], sizes = [2, 128], strides = [1, 1]} : vector<8x128xf32> to vector<2x128xf32>
    %51 = vector.extract_strided_slice %43 {offsets = [6, 0], sizes = [2, 128], strides = [1, 1]} : vector<8x128xf32> to vector<2x128xf32>
    %52 = arith.mulf %49, %34 : vector<2x128xf32>
    %53 = arith.mulf %48, %51 : vector<2x128xf32>
    %54 = arith.addf %52, %53 : vector<2x128xf32>
    %55 = math.tanh %54 : vector<2x128xf32>
    %56 = arith.mulf %50, %55 : vector<2x128xf32>
    %57 = vector.extract_strided_slice %29 {offsets = [2, 0], sizes = [2, 512], strides = [1, 1]} : vector<16x512xf32> to vector<2x512xf32>
    %cst_22 = arith.constant dense<0.000000e+00> : vector<2x512xf32>
    %58 = tpu.matmul %56, %32, %cst_22 {dimension_numbers = #tpu.dot_dimension_numbers<[1], [0], [0], [1], [0, 0, 1, 1], [], []>} : vector<2x128xf32>, vector<128x512xf32>, vector<2x512xf32> -> vector<2x512xf32>
    %59 = arith.addf %57, %58 : vector<2x512xf32>
    %60 = vector.extract_strided_slice %59 {offsets = [0, 0], sizes = [2, 128], strides = [1, 1]} : vector<2x512xf32> to vector<2x128xf32>
    %61 = vector.extract_strided_slice %59 {offsets = [0, 128], sizes = [2, 128], strides = [1, 1]} : vector<2x512xf32> to vector<2x128xf32>
    %62 = vector.extract_strided_slice %59 {offsets = [0, 256], sizes = [2, 128], strides = [1, 1]} : vector<2x512xf32> to vector<2x128xf32>
    %63 = vector.extract_strided_slice %59 {offsets = [0, 384], sizes = [2, 128], strides = [1, 1]} : vector<2x512xf32> to vector<2x128xf32>
    %64 = tpu.concatenate %60, %61, %62, %63 in 0 : vector<2x128xf32>, vector<2x128xf32>, vector<2x128xf32>, vector<2x128xf32> -> vector<8x128xf32>
    %65 = math.tanh %64 : vector<8x128xf32>
    %cst_23 = arith.constant 5.000000e-01 : f32
    %66 = vector.broadcast %cst_23 : f32 to vector<8x128xf32>
    %67 = arith.mulf %65, %66 : vector<8x128xf32>
    %cst_24 = arith.constant 5.000000e-01 : f32
    %68 = vector.broadcast %cst_24 : f32 to vector<8x128xf32>
    %69 = arith.addf %67, %68 : vector<8x128xf32>
    %70 = vector.extract_strided_slice %69 {offsets = [0, 0], sizes = [2, 128], strides = [1, 1]} : vector<8x128xf32> to vector<2x128xf32>
    %71 = vector.extract_strided_slice %69 {offsets = [2, 0], sizes = [2, 128], strides = [1, 1]} : vector<8x128xf32> to vector<2x128xf32>
    %72 = vector.extract_strided_slice %69 {offsets = [4, 0], sizes = [2, 128], strides = [1, 1]} : vector<8x128xf32> to vector<2x128xf32>
    %73 = vector.extract_strided_slice %65 {offsets = [6, 0], sizes = [2, 128], strides = [1, 1]} : vector<8x128xf32> to vector<2x128xf32>
    %74 = arith.mulf %71, %54 : vector<2x128xf32>
    %75 = arith.mulf %70, %73 : vector<2x128xf32>
    %76 = arith.addf %74, %75 : vector<2x128xf32>
    %77 = math.tanh %76 : vector<2x128xf32>
    %78 = arith.mulf %72, %77 : vector<2x128xf32>
    %79 = vector.extract_strided_slice %29 {offsets = [4, 0], sizes = [2, 512], strides = [1, 1]} : vector<16x512xf32> to vector<2x512xf32>
    %cst_25 = arith.constant dense<0.000000e+00> : vector<2x512xf32>
    %80 = tpu.matmul %78, %32, %cst_25 {dimension_numbers = #tpu.dot_dimension_numbers<[1], [0], [0], [1], [0, 0, 1, 1], [], []>} : vector<2x128xf32>, vector<128x512xf32>, vector<2x512xf32> -> vector<2x512xf32>
    %81 = arith.addf %79, %80 : vector<2x512xf32>
    %82 = vector.extract_strided_slice %81 {offsets = [0, 0], sizes = [2, 128], strides = [1, 1]} : vector<2x512xf32> to vector<2x128xf32>
    %83 = vector.extract_strided_slice %81 {offsets = [0, 128], sizes = [2, 128], strides = [1, 1]} : vector<2x512xf32> to vector<2x128xf32>
    %84 = vector.extract_strided_slice %81 {offsets = [0, 256], sizes = [2, 128], strides = [1, 1]} : vector<2x512xf32> to vector<2x128xf32>
    %85 = vector.extract_strided_slice %81 {offsets = [0, 384], sizes = [2, 128], strides = [1, 1]} : vector<2x512xf32> to vector<2x128xf32>
    %86 = tpu.concatenate %82, %83, %84, %85 in 0 : vector<2x128xf32>, vector<2x128xf32>, vector<2x128xf32>, vector<2x128xf32> -> vector<8x128xf32>
    %87 = math.tanh %86 : vector<8x128xf32>
    %cst_26 = arith.constant 5.000000e-01 : f32
    %88 = vector.broadcast %cst_26 : f32 to vector<8x128xf32>
    %89 = arith.mulf %87, %88 : vector<8x128xf32>
    %cst_27 = arith.constant 5.000000e-01 : f32
    %90 = vector.broadcast %cst_27 : f32 to vector<8x128xf32>
    %91 = arith.addf %89, %90 : vector<8x128xf32>
    %92 = vector.extract_strided_slice %91 {offsets = [0, 0], sizes = [2, 128], strides = [1, 1]} : vector<8x128xf32> to vector<2x128xf32>
    %93 = vector.extract_strided_slice %91 {offsets = [2, 0], sizes = [2, 128], strides = [1, 1]} : vector<8x128xf32> to vector<2x128xf32>
    %94 = vector.extract_strided_slice %91 {offsets = [4, 0], sizes = [2, 128], strides = [1, 1]} : vector<8x128xf32> to vector<2x128xf32>
    %95 = vector.extract_strided_slice %87 {offsets = [6, 0], sizes = [2, 128], strides = [1, 1]} : vector<8x128xf32> to vector<2x128xf32>
    %96 = arith.mulf %93, %76 : vector<2x128xf32>
    %97 = arith.mulf %92, %95 : vector<2x128xf32>
    %98 = arith.addf %96, %97 : vector<2x128xf32>
    %99 = math.tanh %98 : vector<2x128xf32>
    %100 = arith.mulf %94, %99 : vector<2x128xf32>
    %101 = vector.extract_strided_slice %29 {offsets = [6, 0], sizes = [2, 512], strides = [1, 1]} : vector<16x512xf32> to vector<2x512xf32>
    %cst_28 = arith.constant dense<0.000000e+00> : vector<2x512xf32>
    %102 = tpu.matmul %100, %32, %cst_28 {dimension_numbers = #tpu.dot_dimension_numbers<[1], [0], [0], [1], [0, 0, 1, 1], [], []>} : vector<2x128xf32>, vector<128x512xf32>, vector<2x512xf32> -> vector<2x512xf32>
    %103 = arith.addf %101, %102 : vector<2x512xf32>
    %104 = vector.extract_strided_slice %103 {offsets = [0, 0], sizes = [2, 128], strides = [1, 1]} : vector<2x512xf32> to vector<2x128xf32>
    %105 = vector.extract_strided_slice %103 {offsets = [0, 128], sizes = [2, 128], strides = [1, 1]} : vector<2x512xf32> to vector<2x128xf32>
    %106 = vector.extract_strided_slice %103 {offsets = [0, 256], sizes = [2, 128], strides = [1, 1]} : vector<2x512xf32> to vector<2x128xf32>
    %107 = vector.extract_strided_slice %103 {offsets = [0, 384], sizes = [2, 128], strides = [1, 1]} : vector<2x512xf32> to vector<2x128xf32>
    %108 = tpu.concatenate %104, %105, %106, %107 in 0 : vector<2x128xf32>, vector<2x128xf32>, vector<2x128xf32>, vector<2x128xf32> -> vector<8x128xf32>
    %109 = math.tanh %108 : vector<8x128xf32>
    %cst_29 = arith.constant 5.000000e-01 : f32
    %110 = vector.broadcast %cst_29 : f32 to vector<8x128xf32>
    %111 = arith.mulf %109, %110 : vector<8x128xf32>
    %cst_30 = arith.constant 5.000000e-01 : f32
    %112 = vector.broadcast %cst_30 : f32 to vector<8x128xf32>
    %113 = arith.addf %111, %112 : vector<8x128xf32>
    %114 = vector.extract_strided_slice %113 {offsets = [0, 0], sizes = [2, 128], strides = [1, 1]} : vector<8x128xf32> to vector<2x128xf32>
    %115 = vector.extract_strided_slice %113 {offsets = [2, 0], sizes = [2, 128], strides = [1, 1]} : vector<8x128xf32> to vector<2x128xf32>
    %116 = vector.extract_strided_slice %113 {offsets = [4, 0], sizes = [2, 128], strides = [1, 1]} : vector<8x128xf32> to vector<2x128xf32>
    %117 = vector.extract_strided_slice %109 {offsets = [6, 0], sizes = [2, 128], strides = [1, 1]} : vector<8x128xf32> to vector<2x128xf32>
    %118 = arith.mulf %115, %98 : vector<2x128xf32>
    %119 = arith.mulf %114, %117 : vector<2x128xf32>
    %120 = arith.addf %118, %119 : vector<2x128xf32>
    %121 = math.tanh %120 : vector<2x128xf32>
    %122 = arith.mulf %116, %121 : vector<2x128xf32>
    %123 = vector.extract_strided_slice %29 {offsets = [8, 0], sizes = [2, 512], strides = [1, 1]} : vector<16x512xf32> to vector<2x512xf32>
    %cst_31 = arith.constant dense<0.000000e+00> : vector<2x512xf32>
    %124 = tpu.matmul %122, %32, %cst_31 {dimension_numbers = #tpu.dot_dimension_numbers<[1], [0], [0], [1], [0, 0, 1, 1], [], []>} : vector<2x128xf32>, vector<128x512xf32>, vector<2x512xf32> -> vector<2x512xf32>
    %125 = arith.addf %123, %124 : vector<2x512xf32>
    %126 = vector.extract_strided_slice %125 {offsets = [0, 0], sizes = [2, 128], strides = [1, 1]} : vector<2x512xf32> to vector<2x128xf32>
    %127 = vector.extract_strided_slice %125 {offsets = [0, 128], sizes = [2, 128], strides = [1, 1]} : vector<2x512xf32> to vector<2x128xf32>
    %128 = vector.extract_strided_slice %125 {offsets = [0, 256], sizes = [2, 128], strides = [1, 1]} : vector<2x512xf32> to vector<2x128xf32>
    %129 = vector.extract_strided_slice %125 {offsets = [0, 384], sizes = [2, 128], strides = [1, 1]} : vector<2x512xf32> to vector<2x128xf32>
    %130 = tpu.concatenate %126, %127, %128, %129 in 0 : vector<2x128xf32>, vector<2x128xf32>, vector<2x128xf32>, vector<2x128xf32> -> vector<8x128xf32>
    %131 = math.tanh %130 : vector<8x128xf32>
    %cst_32 = arith.constant 5.000000e-01 : f32
    %132 = vector.broadcast %cst_32 : f32 to vector<8x128xf32>
    %133 = arith.mulf %131, %132 : vector<8x128xf32>
    %cst_33 = arith.constant 5.000000e-01 : f32
    %134 = vector.broadcast %cst_33 : f32 to vector<8x128xf32>
    %135 = arith.addf %133, %134 : vector<8x128xf32>
    %136 = vector.extract_strided_slice %135 {offsets = [0, 0], sizes = [2, 128], strides = [1, 1]} : vector<8x128xf32> to vector<2x128xf32>
    %137 = vector.extract_strided_slice %135 {offsets = [2, 0], sizes = [2, 128], strides = [1, 1]} : vector<8x128xf32> to vector<2x128xf32>
    %138 = vector.extract_strided_slice %135 {offsets = [4, 0], sizes = [2, 128], strides = [1, 1]} : vector<8x128xf32> to vector<2x128xf32>
    %139 = vector.extract_strided_slice %131 {offsets = [6, 0], sizes = [2, 128], strides = [1, 1]} : vector<8x128xf32> to vector<2x128xf32>
    %140 = arith.mulf %137, %120 : vector<2x128xf32>
    %141 = arith.mulf %136, %139 : vector<2x128xf32>
    %142 = arith.addf %140, %141 : vector<2x128xf32>
    %143 = math.tanh %142 : vector<2x128xf32>
    %144 = arith.mulf %138, %143 : vector<2x128xf32>
    %145 = vector.extract_strided_slice %29 {offsets = [10, 0], sizes = [2, 512], strides = [1, 1]} : vector<16x512xf32> to vector<2x512xf32>
    %cst_34 = arith.constant dense<0.000000e+00> : vector<2x512xf32>
    %146 = tpu.matmul %144, %32, %cst_34 {dimension_numbers = #tpu.dot_dimension_numbers<[1], [0], [0], [1], [0, 0, 1, 1], [], []>} : vector<2x128xf32>, vector<128x512xf32>, vector<2x512xf32> -> vector<2x512xf32>
    %147 = arith.addf %145, %146 : vector<2x512xf32>
    %148 = vector.extract_strided_slice %147 {offsets = [0, 0], sizes = [2, 128], strides = [1, 1]} : vector<2x512xf32> to vector<2x128xf32>
    %149 = vector.extract_strided_slice %147 {offsets = [0, 128], sizes = [2, 128], strides = [1, 1]} : vector<2x512xf32> to vector<2x128xf32>
    %150 = vector.extract_strided_slice %147 {offsets = [0, 256], sizes = [2, 128], strides = [1, 1]} : vector<2x512xf32> to vector<2x128xf32>
    %151 = vector.extract_strided_slice %147 {offsets = [0, 384], sizes = [2, 128], strides = [1, 1]} : vector<2x512xf32> to vector<2x128xf32>
    %152 = tpu.concatenate %148, %149, %150, %151 in 0 : vector<2x128xf32>, vector<2x128xf32>, vector<2x128xf32>, vector<2x128xf32> -> vector<8x128xf32>
    %153 = math.tanh %152 : vector<8x128xf32>
    %cst_35 = arith.constant 5.000000e-01 : f32
    %154 = vector.broadcast %cst_35 : f32 to vector<8x128xf32>
    %155 = arith.mulf %153, %154 : vector<8x128xf32>
    %cst_36 = arith.constant 5.000000e-01 : f32
    %156 = vector.broadcast %cst_36 : f32 to vector<8x128xf32>
    %157 = arith.addf %155, %156 : vector<8x128xf32>
    %158 = vector.extract_strided_slice %157 {offsets = [0, 0], sizes = [2, 128], strides = [1, 1]} : vector<8x128xf32> to vector<2x128xf32>
    %159 = vector.extract_strided_slice %157 {offsets = [2, 0], sizes = [2, 128], strides = [1, 1]} : vector<8x128xf32> to vector<2x128xf32>
    %160 = vector.extract_strided_slice %157 {offsets = [4, 0], sizes = [2, 128], strides = [1, 1]} : vector<8x128xf32> to vector<2x128xf32>
    %161 = vector.extract_strided_slice %153 {offsets = [6, 0], sizes = [2, 128], strides = [1, 1]} : vector<8x128xf32> to vector<2x128xf32>
    %162 = arith.mulf %159, %142 : vector<2x128xf32>
    %163 = arith.mulf %158, %161 : vector<2x128xf32>
    %164 = arith.addf %162, %163 : vector<2x128xf32>
    %165 = math.tanh %164 : vector<2x128xf32>
    %166 = arith.mulf %160, %165 : vector<2x128xf32>
    %167 = vector.extract_strided_slice %29 {offsets = [12, 0], sizes = [2, 512], strides = [1, 1]} : vector<16x512xf32> to vector<2x512xf32>
    %cst_37 = arith.constant dense<0.000000e+00> : vector<2x512xf32>
    %168 = tpu.matmul %166, %32, %cst_37 {dimension_numbers = #tpu.dot_dimension_numbers<[1], [0], [0], [1], [0, 0, 1, 1], [], []>} : vector<2x128xf32>, vector<128x512xf32>, vector<2x512xf32> -> vector<2x512xf32>
    %169 = arith.addf %167, %168 : vector<2x512xf32>
    %170 = vector.extract_strided_slice %169 {offsets = [0, 0], sizes = [2, 128], strides = [1, 1]} : vector<2x512xf32> to vector<2x128xf32>
    %171 = vector.extract_strided_slice %169 {offsets = [0, 128], sizes = [2, 128], strides = [1, 1]} : vector<2x512xf32> to vector<2x128xf32>
    %172 = vector.extract_strided_slice %169 {offsets = [0, 256], sizes = [2, 128], strides = [1, 1]} : vector<2x512xf32> to vector<2x128xf32>
    %173 = vector.extract_strided_slice %169 {offsets = [0, 384], sizes = [2, 128], strides = [1, 1]} : vector<2x512xf32> to vector<2x128xf32>
    %174 = tpu.concatenate %170, %171, %172, %173 in 0 : vector<2x128xf32>, vector<2x128xf32>, vector<2x128xf32>, vector<2x128xf32> -> vector<8x128xf32>
    %175 = math.tanh %174 : vector<8x128xf32>
    %cst_38 = arith.constant 5.000000e-01 : f32
    %176 = vector.broadcast %cst_38 : f32 to vector<8x128xf32>
    %177 = arith.mulf %175, %176 : vector<8x128xf32>
    %cst_39 = arith.constant 5.000000e-01 : f32
    %178 = vector.broadcast %cst_39 : f32 to vector<8x128xf32>
    %179 = arith.addf %177, %178 : vector<8x128xf32>
    %180 = vector.extract_strided_slice %179 {offsets = [0, 0], sizes = [2, 128], strides = [1, 1]} : vector<8x128xf32> to vector<2x128xf32>
    %181 = vector.extract_strided_slice %179 {offsets = [2, 0], sizes = [2, 128], strides = [1, 1]} : vector<8x128xf32> to vector<2x128xf32>
    %182 = vector.extract_strided_slice %179 {offsets = [4, 0], sizes = [2, 128], strides = [1, 1]} : vector<8x128xf32> to vector<2x128xf32>
    %183 = vector.extract_strided_slice %175 {offsets = [6, 0], sizes = [2, 128], strides = [1, 1]} : vector<8x128xf32> to vector<2x128xf32>
    %184 = arith.mulf %181, %164 : vector<2x128xf32>
    %185 = arith.mulf %180, %183 : vector<2x128xf32>
    %186 = arith.addf %184, %185 : vector<2x128xf32>
    %187 = math.tanh %186 : vector<2x128xf32>
    %188 = arith.mulf %182, %187 : vector<2x128xf32>
    %189 = vector.extract_strided_slice %29 {offsets = [14, 0], sizes = [2, 512], strides = [1, 1]} : vector<16x512xf32> to vector<2x512xf32>
    %cst_40 = arith.constant dense<0.000000e+00> : vector<2x512xf32>
    %190 = tpu.matmul %188, %32, %cst_40 {dimension_numbers = #tpu.dot_dimension_numbers<[1], [0], [0], [1], [0, 0, 1, 1], [], []>} : vector<2x128xf32>, vector<128x512xf32>, vector<2x512xf32> -> vector<2x512xf32>
    %191 = arith.addf %189, %190 : vector<2x512xf32>
    %192 = vector.extract_strided_slice %191 {offsets = [0, 0], sizes = [2, 128], strides = [1, 1]} : vector<2x512xf32> to vector<2x128xf32>
    %193 = vector.extract_strided_slice %191 {offsets = [0, 128], sizes = [2, 128], strides = [1, 1]} : vector<2x512xf32> to vector<2x128xf32>
    %194 = vector.extract_strided_slice %191 {offsets = [0, 256], sizes = [2, 128], strides = [1, 1]} : vector<2x512xf32> to vector<2x128xf32>
    %195 = vector.extract_strided_slice %191 {offsets = [0, 384], sizes = [2, 128], strides = [1, 1]} : vector<2x512xf32> to vector<2x128xf32>
    %196 = tpu.concatenate %192, %193, %194, %195 in 0 : vector<2x128xf32>, vector<2x128xf32>, vector<2x128xf32>, vector<2x128xf32> -> vector<8x128xf32>
    %197 = math.tanh %196 : vector<8x128xf32>
    %cst_41 = arith.constant 5.000000e-01 : f32
    %198 = vector.broadcast %cst_41 : f32 to vector<8x128xf32>
    %199 = arith.mulf %197, %198 : vector<8x128xf32>
    %cst_42 = arith.constant 5.000000e-01 : f32
    %200 = vector.broadcast %cst_42 : f32 to vector<8x128xf32>
    %201 = arith.addf %199, %200 : vector<8x128xf32>
    %202 = vector.extract_strided_slice %201 {offsets = [0, 0], sizes = [2, 128], strides = [1, 1]} : vector<8x128xf32> to vector<2x128xf32>
    %203 = vector.extract_strided_slice %201 {offsets = [2, 0], sizes = [2, 128], strides = [1, 1]} : vector<8x128xf32> to vector<2x128xf32>
    %204 = vector.extract_strided_slice %201 {offsets = [4, 0], sizes = [2, 128], strides = [1, 1]} : vector<8x128xf32> to vector<2x128xf32>
    %205 = vector.extract_strided_slice %197 {offsets = [6, 0], sizes = [2, 128], strides = [1, 1]} : vector<8x128xf32> to vector<2x128xf32>
    %206 = arith.mulf %203, %186 : vector<2x128xf32>
    %207 = arith.mulf %202, %205 : vector<2x128xf32>
    %208 = arith.addf %206, %207 : vector<2x128xf32>
    %209 = math.tanh %208 : vector<2x128xf32>
    %210 = arith.mulf %204, %209 : vector<2x128xf32>
    %c1_i32_43 = arith.constant 1 : i32
    %211 = tpu.memref_slice %arg11[%c1_i32_43] : memref<2x!tpu.dma_semaphore, #tpu.memory_space<semaphore_mem>> -> memref<1x!tpu.dma_semaphore, #tpu.memory_space<semaphore_mem>>
    %212 = tpu.memref_squeeze %211 : memref<1x!tpu.dma_semaphore, #tpu.memory_space<semaphore_mem>> -> memref<!tpu.dma_semaphore, #tpu.memory_space<semaphore_mem>>
    tpu.wait_dma2 semaphore(%212 : memref<!tpu.dma_semaphore, #tpu.memory_space<semaphore_mem>>) src(%arg6 : memref<128x128xf32, #tpu.memory_space<any>>) dst(%arg10 : memref<128x128xf32, #tpu.memory_space<vmem>>)
    %c0_44 = arith.constant 0 : index
    %c0_45 = arith.constant 0 : index
    %213 = vector.load %arg10[%c0_44, %c0_45] : memref<128x128xf32, #tpu.memory_space<vmem>>, vector<128x128xf32>
    %cst_46 = arith.constant dense<0.000000e+00> : vector<2x128xf32>
    %214 = tpu.matmul %210, %213, %cst_46 {dimension_numbers = #tpu.dot_dimension_numbers<[1], [0], [0], [1], [0, 0, 1, 1], [], []>} : vector<2x128xf32>, vector<128x128xf32>, vector<2x128xf32> -> vector<2x128xf32>
    %c0_47 = arith.constant 0 : index
    %c0_48 = arith.constant 0 : index
    %215 = vector.load %arg7[%c0_47, %c0_48] : memref<1x128xf32, #tpu.memory_space<vmem>>, vector<1x128xf32>
    %216 = vector.broadcast %215 : vector<1x128xf32> to vector<2x128xf32>
    %217 = arith.addf %214, %216 : vector<2x128xf32>
    %c0_49 = arith.constant 0 : index
    %c0_50 = arith.constant 0 : index
    %218 = vector.load %arg8[%c0_49, %c0_50] : memref<2x128xf32, #tpu.memory_space<vmem>>, vector<2x128xf32>
    tpu.vector_store %arg8[%c0_49, %c0_50], %217 {strides = array<i32>} : memref<2x128xf32, #tpu.memory_space<vmem>>, vector<2x128xf32>,
    return
  }
}

</mosaic_0001>

<bundles_post_ra>
// kernel: cnn_lstm_forward.1
= control target key start
LH: loop header
LB: loop body
LE: loop exit
PB: predicated region body
PF: predicated region fallthrough
CT: control target
= control target key end

     0   :  { %13 = vsyncpa [#allocation6], 0  ;;  %s4001_s0 = inlined_call_operand.vmem [shape: f32[2,16,4], index: 0, kind: input, shape index: {}]   ;;  %s4002_s1 = inlined_call_operand.vmem [shape: f32[20,64], index: 1, kind: input, shape index: {}]   ;;  %s4003_s2 = inlined_call_operand.vmem [shape: f32[1,64], index: 2, kind: input, shape index: {}]   ;;  %s4004_s3 = inlined_call_operand.hbm [shape: f32[64,512], index: 3, kind: input, shape index: {}]   ;;  %s4005_s4 = inlined_call_operand.vmem [shape: f32[1,512], index: 4, kind: input, shape index: {}]   ;;  %s4006_s5 = inlined_call_operand.hbm [shape: f32[128,512], index: 5, kind: input, shape index: {}]   ;;  %s4007_s6 = inlined_call_operand.hbm [shape: f32[128,128], index: 6, kind: input, shape index: {}]   ;;  %s4008_s7 = inlined_call_operand.vmem [shape: f32[1,128], index: 7, kind: input, shape index: {}]   ;;  %s4009_s8 = inlined_call_operand.hbm [shape: f32[2,128], index: 8, kind: output, shape index: {}]  }
   0x1   :  { %14 = vsyncpa [#allocation7], 0  ;;  %s2851_s27 = smov [#allocation5]  }
   0x2   :  { %s26_s28 = sshll.u32 %s2851_s27, 4  ;;  %s27_s28 = int_to_ptr.vmem [resolvable:$true] %s26_s28 }
   0x3   :  { %s2771_s29 = scalar_lea.vmem %s27_s28, 4096  ;;  %p2776_p1 = scmp.lt.s32.totalorder %s27_s28, %s27_s28 }
   0x4   :  { %p2772_p0 = scmp.ne.s32.totalorder %s27_s28, %s2771_s29  ;;  %p2777_p2 = scmp.lt.s32.totalorder %s2771_s29, %s2771_s29 }
   0x6   :  { %p2778_p3 = por %p2777_p2, %p2776_p1 }
   0x8   :  { %p2779_p4 = pnand %p2778_p3, %p2772_p0 }
   0xa   :  { %2782 = shalt.err (!%p2779_p4)
}
   0xb   :  { %s2852_s30 = smov 512   ;;  %s2853_s9 = smov 32  }
   0xc   :  { %32 = dma.hbm_to_vmem [thread:$0]  %s4004_s3, 4096, %s27_s28, [#allocation6], %s2852_s30, %s2852_s30, %s2853_s9  }
   0xd   :  { %2843 = dma.done.wait [#allocation6], 4096  }
   0xe   :  { %2844 = vsyncadd [#allocation6], 4294963200  ;;  %v63_v0 = vld [vmem:[%s4001_s0] sm:$0xff]  ;;  %v64_v1 = vld [vmem:[%s4001_s0 + $0x8] sm:$0xff]  ;;  %vm71_vm0 = vcmask 1041408   ;;  %vm115_vm1 = vcmask 1045504  }
   0xf   :  { %v65_v2 = vld [vmem:[%s4001_s0 + $0x10] sm:$0xff]  ;;  %v72_v3 = vrot.slane %v63_v0, 6  ;;  %v73_v4 = vrot.slane %v64_v1, 6  ;;  %vm92_vm2 = vcmask 1046528   ;;  %v66_v5 = vld [vmem:[%s4001_s0 + $0x18] sm:$0xff]  ;;  %vm161_vm3 = vcmask 1043456  }
  0x10   :  { %v206_v6 = vld [vmem:[%s4002_s1 + $0x10] sm:$0xf]  ;;  %v75_v10 = vrot.slane %v65_v2, 6  ;;  %v76_v17 = vrot.slane %v66_v5, 6  ;;  %v205_v20 = vld [vmem:[%s4002_s1 + $0x8] sm:$0xff]  ;;  %s2854_s22 = smov 8  }
  0x11   :  { %v2929_v7 = vsel %vm71_vm0, %v72_v3, %v73_v4  ;;  %v2932_v8 = vsel %vm71_vm0, 0.0, %v72_v3  ;;  %v86_v9 = vsel %vm71_vm0, %v73_v4, 0.0  ;;  %2606 = vmatprep.subr.msk.mxu0 %vm161_vm3, %v206_v6  ;;  %s2855_s23 = smov 4   ;;  %vm138_vm4 = vcmask 1044480   ;;  %v204_v23 = vld [vmem:[%s4002_s1] sm:$0xff]  ;;  %s2856_s1 = smov 12  }
  0x12   :  { %v116_v11 = vrot.slane %v2932_v8, 2  ;;  %v117_v12 = vrot.slane %v2929_v7, 2  ;;  %v93_v13 = vrot.slane %v2932_v8, 1  ;;  %v94_v14 = vrot.slane %v2929_v7, 1  ;;  %2607 = vmatpush3.msk.msra.mxu0 %vm161_vm3, %v206_v6  ;;  %s2857_s26 = smov 16   ;;  %s2862_s30 = smov [#allocation3]  }
  0x13   :  { %v119_v15 = vrot.slane %v86_v9, 2  ;;  %v96_v16 = vrot.slane %v86_v9, 1  ;;  %v140_v21 = vrot.slane %v2929_v7, 3  ;;  %v142_v22 = vrot.slane %v86_v9, 3  ;;  %2608 = vmatprep.subr.mxu0 %v205_v20  ;;  %s59_s9 = sshll.u32 %s2862_s30, 4  ;;  %s60_s9 = int_to_ptr.vmem [resolvable:$true] %s59_s9 }
  0x14   :  { %v118_v18 = vsel %vm115_vm1, %v116_v11, %v117_v12  ;;  %v95_v19 = vsel %vm92_vm2, %v93_v13, %v94_v14  ;;  %v139_v26 = vrot.slane %v2932_v8, 3  ;;  %v2956_v27 = vsel %vm71_vm0, 0.0, %v75_v10  ;;  %2609 = vmatpush3.msra.mxu0 %v205_v20 }
  0x15   :  { %126 = vrot.lane.b32.xlu1 %v118_v18, %s2854_s22  ;;  %103 = vrot.lane.b32.xlu0 %v95_v19, %s2855_s23  ;;  %v120_v24 = vsel %vm115_vm1, %v117_v12, %v119_v15  ;;  %v97_v25 = vsel %vm92_vm2, %v94_v14, %v96_v16  ;;  %v2959_v28 = vsel %vm71_vm0, %v75_v10, %v76_v17  ;;  %v98_v30 = vrot.slane %v2956_v27, 1 }
  0x16   :  { %2610 = vmatprep.subr.mxu0 %v204_v23  ;;  %v143_v29 = vsel %vm138_vm4, %v140_v21, %v142_v22  ;;  %v141_v31 = vsel %vm138_vm4, %v139_v26, %v140_v21  ;;  %v99_v32 = vrot.slane %v2959_v28, 1  ;;  %v162_v33 = vrot.slane %v2932_v8, 4  ;;  %v654_v26 = vld [vmem:[#allocation5 + $0xe8] sm:$0xff] }
  0x17   :  { %v163_v34 = vrot.slane %v2929_v7, 4  ;;  %2611 = vmatpush3.msra.mxu0 %v204_v23  ;;  %v87_v35 = vsel %vm71_vm0, %v76_v17, 0.0  ;;  %v165_v39 = vrot.slane %v86_v9, 4  ;;  %v122_v40 = vrot.slane %v2959_v28, 2 }
  0x18   :  { %v100_v36 = vsel %vm92_vm2, %v98_v30, %v99_v32  ;;  %v101_v38 = vrot.slane %v87_v35, 1  ;;  %v121_v41 = vrot.slane %v2956_v27, 2  ;;  %v124_v44 = vrot.slane %v87_v35, 2  ;;  %742 = vmatprep.subr.mxu0 %v654_v26  ;;  %v646_v30 = vld [vmem:[#allocation5 + $0xa8] sm:$0xff] }
  0x19   :  { %128 = vrot.lane.b32.xlu1 %v120_v24, %s2854_s22  ;;  %105 = vrot.lane.b32.xlu0 %v97_v25, %s2855_s23  ;;  %v164_v37 = vsel %vm161_vm3, %v162_v33, %v163_v34  ;;  %v166_v43 = vsel %vm161_vm3, %v163_v34, %v165_v39  ;;  %v145_v47 = vrot.slane %v2959_v28, 3  ;;  %v147_v48 = vrot.slane %v87_v35, 3  ;;  %v641_v33 = vld [vmem:[#allocation5 + $0x80] sm:$0xff]  ;;  %v638_v34 = vld [vmem:[#allocation5 + $0x68] sm:$0xff] }
  0x1a   :  { %v102_v42 = vsel %vm92_vm2, %v99_v32, %v101_v38  ;;  %v123_v45 = vsel %vm115_vm1, %v121_v41, %v122_v40  ;;  %v125_v46 = vsel %vm115_vm1, %v122_v40, %v124_v44  ;;  %v144_v49 = vrot.slane %v2956_v27, 3  ;;  %v642_v32 = vld [vmem:[#allocation5 + $0x88] sm:$0xff]  ;;  %v629_v39 = vld [vmem:[#allocation5 + $0x20] sm:$0xff] }
  0x1b   :  { %v168_v50 = vrot.slane %v2959_v28, 4  ;;  %v148_v51 = vsel %vm138_vm4, %v145_v47, %v147_v48  ;;  %v170_v53 = vrot.slane %v87_v35, 4  ;;  %v167_v54 = vrot.slane %v2956_v27, 4  ;;  %v637_v35 = vld [vmem:[#allocation5 + $0x60] sm:$0xff]  ;;  %v630_v38 = vld [vmem:[#allocation5 + $0x28] sm:$0xff] }
  0x1c   :  { %v146_v52 = vsel %vm138_vm4, %v144_v49, %v145_v47  ;;  %vm184_vm5 = vcmask 31744   ;;  %vm189_vm6 = vcmask 64512   ;;  %vm194_vm7 = vcmask 97280   ;;  %v626_v40 = vld [vmem:[#allocation5 + $0x8] sm:$0xff]  ;;  %v625_v41 = vld [vmem:[#allocation5] sm:$0xff] }
  0x1d   :  { %151 = vrot.lane.b32.xlu1 %v143_v29, %s2856_s1  ;;  %149 = vrot.lane.b32.xlu0 %v141_v31, %s2856_s1  ;;  %v171_v55 = vsel %vm161_vm3, %v168_v50, %v170_v53  ;;  %v169_v56 = vsel %vm161_vm3, %v167_v54, %v168_v50  ;;  %vm199_vm8 = vcmask 130048   ;;  %vm214_vm9 = vcmask 162816   ;;  %v649_v29 = vld [vmem:[#allocation5 + $0xc0] sm:$0xff] }
  0x1e   :  { %v4010_v25 = vmov 0.0   ;;  %v645_v31 = vld [vmem:[#allocation5 + $0xa0] sm:$0xff]  ;;  %vm407_vm10 = vcmask 517120   ;;  %vm536_vm11 = vcmask 1041409   ;;  %vm538_vm12 = vcmask 1042434  }
  0x1f   :  { %vm540_vm13 = vcmask 1043459   ;;  %vm542_vm14 = vcmask 1044484   ;;  %vm544_vm15 = vcmask 1045509   ;;  %vm546_vm2 = vcmask 1046534  }
  0x20   :  { %vm548_vm4 = vcmask 1047559  }
  0x21   :  { %107 = vrot.lane.b32.xlu1 %v100_v36, %s2855_s23  ;;  %172 = vrot.lane.b32.xlu0 %v164_v37, %s2857_s26  ;;  %v634_v36 = vld [vmem:[#allocation5 + $0x48] sm:$0xff]  ;;  %v633_v37 = vld [vmem:[#allocation5 + $0x40] sm:$0xff] }
  0x25   :  { %109 = vrot.lane.b32.xlu1 %v102_v42, %s2855_s23  ;;  %174 = vrot.lane.b32.xlu0 %v166_v43, %s2857_s26  ;;  %v656_v42 = vld [vmem:[#allocation5 + $0xf8] sm:$0xff]  ;;  %v2859_v43 = vmov 1983009808  }
  0x26   :  { %v325_v44 = vunpack.c.l.s4 %v2859_v43 }
  0x28   :  { %v326_v47 = vunpack.c.0.s8 %v325_v44 }
  0x29   :  { %132 = vrot.lane.b32.xlu1 %v125_v46, %s2854_s22  ;;  %130 = vrot.lane.b32.xlu0 %v123_v45, %s2854_s22  ;;  %v327_v45 = vlaneseq  ;;  %v2569_v46 = vld [vmem:[%s4003_s2] ss:$0 sm:$0xff]  ;;  %s2861_s2 = smov [#allocation2]  }
  0x2a   :  { %s47_s29 = sshll.u32 %s2861_s2, 4  ;;  %s48_s29 = int_to_ptr.vmem [resolvable:$true] %s47_s29 }
  0x2b   :  { %v3018_v48 = vshrl.u32 %v327_v45, 7  ;;  %s2791_s10 = scalar_lea.vmem %s48_s29, 8192  ;;  %p2796_p6 = scmp.lt.s32.totalorder %s48_s29, %s48_s29 }
  0x2c   :  { %p2792_p5 = scmp.ne.s32.totalorder %s48_s29, %s2791_s10  ;;  %p2797_p7 = scmp.lt.s32.totalorder %s2791_s10, %s2791_s10 }
  0x2d   :  { %155 = vrot.lane.b32.xlu1 %v148_v51, %s2856_s1  ;;  %153 = vrot.lane.b32.xlu0 %v146_v52, %s2856_s1  ;;  %v3021_v53 = vsub.s32 %v326_v47, %v3018_v48 }
  0x2e   :  { %p2798_p8 = por %p2797_p7, %p2796_p6 }
  0x30   :  { %p2799_p9 = pnand %p2798_p8, %p2792_p5 }
  0x31   :  { %178 = vrot.lane.b32.xlu1 %v171_v55, %s2857_s26  ;;  %176 = vrot.lane.b32.xlu0 %v169_v56, %s2857_s26 }
  0x87   :  { %v127_v57 = vpop.permute.xlu1 %126  ;;  %v104_v58 = vpop.permute.xlu0 %103 }
  0x88   :  { %v185_v61 = vsel %vm184_vm5, %v2932_v8, %v104_v58 }
  0x89   :  { %v190_v0 = vsel %vm189_vm6, %v185_v61, %v127_v57 }
  0x8b   :  { %v129_v59 = vpop.permute.xlu1 %128  ;;  %v106_v60 = vpop.permute.xlu0 %105 }
  0x8c   :  { %v186_v1 = vsel %vm184_vm5, %v2929_v7, %v106_v60 }
  0x8d   :  { %v191_v6 = vsel %vm189_vm6, %v186_v1, %v129_v59 }
  0x8f   :  { %v152_v62 = vpop.permute.xlu1 %151  ;;  %v150_v63 = vpop.permute.xlu0 %149 }
  0x90   :  { %v195_v2 = vsel %vm194_vm7, %v190_v0, %v150_v63  ;;  %v196_v8 = vsel %vm194_vm7, %v191_v6, %v152_v62 }
  0x93   :  { %v108_v3 = vpop.permute.xlu1 %107  ;;  %v173_v4 = vpop.permute.xlu0 %172 }
  0x94   :  { %v200_v5 = vsel %vm199_vm8, %v195_v2, %v173_v4  ;;  %v187_v15 = vsel %vm184_vm5, %v2956_v27, %v108_v3  ;;  %v653_v27 = vld [vmem:[#allocation5 + $0xe0] sm:$0xff] }
  0x95   :  { %2612 = vmatprep.mubr.msk.f32.mxu0 %vm214_vm9, %v200_v5 }
  0x97   :  { %v110_v9 = vpop.permute.xlu1 %109  ;;  %v175_v10 = vpop.permute.xlu0 %174 }
  0x98   :  { %v201_v11 = vsel %vm199_vm8, %v196_v8, %v175_v10  ;;  %v188_v16 = vsel %vm184_vm5, %v2959_v28, %v110_v9  ;;  %v650_v28 = vld [vmem:[#allocation5 + $0xc8] sm:$0xff]  ;;  %vm721_vm5 = vcmask 523264  }
  0x99   :  { %2613 = vmatmul.mubr.msk.f32.vlgmr.msra.gmra.mxu0 %vm214_vm9, %v201_v11 }
  0x9a   :  { %743 = vmatpush1.msra.mxu0 %v653_v27 }
  0x9b   :  { %v133_v12 = vpop.permute.xlu1 %132  ;;  %v131_v7 = vpop.permute.xlu0 %130  ;;  %744 = vmatprep.subr.mxu0 %v650_v28 }
  0x9c   :  { %v193_v17 = vsel %vm189_vm6, %v188_v16, %v133_v12  ;;  %v192_v18 = vsel %vm189_vm6, %v187_v15, %v131_v7  ;;  %745 = vmatpush1.msra.mxu0 %v649_v29 }
  0x9d   :  { %746 = vmatprep.subr.mxu0 %v646_v30 }
  0x9e   :  { %747 = vmatpush1.msra.mxu0 %v645_v31 }
  0x9f   :  { %v156_v13 = vpop.permute.xlu1 %155  ;;  %v154_v14 = vpop.permute.xlu0 %153  ;;  %748 = vmatprep.subr.mxu0 %v642_v32 }
  0xa0   :  { %v198_v19 = vsel %vm194_vm7, %v193_v17, %v156_v13  ;;  %v197_v20 = vsel %vm194_vm7, %v192_v18, %v154_v14  ;;  %749 = vmatpush1.msra.mxu0 %v641_v33 }
  0xa1   :  { %750 = vmatprep.subr.mxu0 %v638_v34 }
  0xa2   :  { %751 = vmatpush1.msra.mxu0 %v637_v35 }
  0xa3   :  { %v179_v21 = vpop.permute.xlu1 %178  ;;  %v177_v22 = vpop.permute.xlu0 %176  ;;  %752 = vmatprep.subr.mxu0 %v634_v36 }
  0xa4   :  { %v203_v23 = vsel %vm199_vm8, %v198_v19, %v179_v21  ;;  %v202_v24 = vsel %vm199_vm8, %v197_v20, %v177_v22  ;;  %753 = vmatpush1.msra.mxu0 %v633_v37 }
  0xa5   :  { %2615 = vmatprep.mubr.msk.f32.mxu0 %vm214_vm9, %v202_v24  ;;  %754 = vmatprep.subr.mxu0 %v630_v38 }
  0xa6   :  { %2616 = vmatmul.mubr.msk.f32.gmra.mxu0 %vm214_vm9, %v203_v23 }
  0xa7   :  { %790 = vmatprep.mubr.f32.mxu0 %v4010_v25  ;;  %755 = vmatpush1.msra.mxu0 %v629_v39 }
  0xa8   :  { %756 = vmatprep.subr.mxu0 %v626_v40 }
  0xa9   :  { %757 = vmatpush1.msra.mxu0 %v625_v41 }
  0xaa   :  { %819 = vmatprep.subr.mxu0 %v656_v42 }
 0x159   :  { %v2614_v49 = vpop.f32.mrf.mxu0 }
 0x15a   :  { %v302_v50 = vadd.f32 %v2614_v49, %v2569_v46 }
 0x15b   :  { %v296_v51 = vpop.f32.mrf.mxu0 }
 0x15c   :  { %v316_v52 = vmax.f32 %v302_v50, 0.0  ;;  %v297_v54 = vadd.f32 %v2569_v46, %v296_v51 }
 0x15e   :  { %v315_v55 = vmax.f32 %v297_v54, 0.0  ;;  %v347_v56 = vrot.slane %v316_v52, %v3021_v53  ;;  %v340_v58 = vcombine.high %v316_v52, %v316_v52 }
 0x160   :  { %v323_v57 = vcombine.high %v315_v55, %v315_v55  ;;  %v330_v59 = vrot.slane %v315_v55, %v3021_v53  ;;  %v436_v62 = vsel %vm407_vm10, %v347_v56, -inf  ;;  %v354_v2 = vrot.slane %v340_v58, %v3021_v53 }
 0x161   :  { %v355_v3 = vcombine.high %v347_v56, %v347_v56  ;;  %v437_v9 = vrot.slane %v436_v62, 4 }
 0x162   :  { %v337_v60 = vrot.slane %v323_v57, %v3021_v53  ;;  %v338_v61 = vcombine.high %v330_v59, %v330_v59  ;;  %v408_v0 = vsel %vm407_vm10, %v330_v59, -inf  ;;  %v450_v15 = vsel %vm407_vm10, %v354_v2, -inf }
 0x163   :  { %v409_v4 = vrot.slane %v408_v0, 4  ;;  %v443_v14 = vsel %vm407_vm10, %v355_v3, -inf  ;;  %v356_v20 = vcombine.high %v354_v2, %v354_v2  ;;  %v438_v21 = vmax.f32 %v436_v62, %v437_v9 }
 0x164   :  { %v339_v63 = vcombine.high %v337_v60, %v337_v60  ;;  %v422_v1 = vsel %vm407_vm10, %v337_v60, -inf  ;;  %v415_v5 = vsel %vm407_vm10, %v338_v61, -inf  ;;  %v444_v22 = vrot.slane %v443_v14, 4 }
 0x165   :  { %v423_v6 = vrot.slane %v422_v1, 4  ;;  %v410_v10 = vmax.f32 %v408_v0, %v409_v4  ;;  %v416_v11 = vrot.slane %v415_v5, 4  ;;  %v451_v27 = vrot.slane %v450_v15, 4 }
 0x166   :  { %v429_v8 = vsel %vm407_vm10, %v339_v63, -inf  ;;  %v2617_v13 = vpop.f32.mrf.mxu0  ;;  %v457_v32 = vsel %vm407_vm10, %v356_v20, -inf  ;;  %v439_v35 = vrot.slane %v438_v21, 2  ;;  %v445_v36 = vmax.f32 %v443_v14, %v444_v22 }
 0x167   :  { %v424_v12 = vmax.f32 %v422_v1, %v423_v6  ;;  %v430_v7 = vrot.slane %v429_v8, 4  ;;  %v411_v16 = vrot.slane %v410_v10, 2  ;;  %v417_v17 = vmax.f32 %v415_v5, %v416_v11 }
 0x168   :  { %v306_v26 = vpop.f32.mrf.mxu0  ;;  %v312_v28 = vadd.f32 %v2617_v13, %v2569_v46  ;;  %v452_v39 = vmax.f32 %v450_v15, %v451_v27  ;;  %v458_v43 = vrot.slane %v457_v32, 4  ;;  %v440_v52 = vmax.f32 %v438_v21, %v439_v35 }
 0x169   :  { %v425_v18 = vrot.slane %v424_v12, 2  ;;  %v431_v19 = vmax.f32 %v429_v8, %v430_v7  ;;  %v412_v23 = vmax.f32 %v410_v10, %v411_v16  ;;  %v418_v24 = vrot.slane %v417_v17, 2 }
 0x16a   :  { %v318_v33 = vmax.f32 %v312_v28, 0.0  ;;  %v307_v34 = vadd.f32 %v2569_v46, %v306_v26  ;;  %v446_v54 = vrot.slane %v445_v36, 2  ;;  %v453_v57 = vrot.slane %v452_v39, 2 }
 0x16b   :  { %v419_v29 = vmax.f32 %v417_v17, %v418_v24  ;;  %v426_v30 = vmax.f32 %v424_v12, %v425_v18  ;;  %v432_v31 = vrot.slane %v431_v19, 2  ;;  %v413_v37 = vrot.slane %v412_v23, 1 }
 0x16c   :  { %v374_v40 = vcombine.high %v318_v33, %v318_v33  ;;  %v381_v41 = vrot.slane %v318_v33, %v3021_v53  ;;  %v317_v42 = vmax.f32 %v307_v34, 0.0  ;;  %v441_v5 = vrot.slane %v440_v52, 1 }
 0x16d   :  { %v420_v38 = vrot.slane %v419_v29, 1  ;;  %v427_v45 = vrot.slane %v426_v30, 1  ;;  %v433_v47 = vmax.f32 %v431_v19, %v432_v31  ;;  %v414_v55 = vmax.f32 %v412_v23, %v413_v37 }
 0x16e   :  { %v388_v49 = vrot.slane %v374_v40, %v3021_v53  ;;  %v389_v50 = vcombine.high %v381_v41, %v381_v41  ;;  %v492_v51 = vsel %vm407_vm10, %v381_v41, -inf  ;;  %v357_v46 = vcombine.high %v317_v42, %v317_v42 }
 0x16f   :  { %v421_v44 = vmax.f32 %v419_v29, %v420_v38  ;;  %v364_v56 = vrot.slane %v317_v42, %v3021_v53  ;;  %v428_v61 = vmax.f32 %v426_v30, %v427_v45  ;;  %v434_v62 = vrot.slane %v433_v47, 1 }
 0x170   :  { %v390_v58 = vcombine.high %v388_v49, %v388_v49  ;;  %v499_v59 = vsel %vm407_vm10, %v389_v50, -inf  ;;  %v506_v60 = vsel %vm407_vm10, %v388_v49, -inf  ;;  %v493_v0 = vrot.slane %v492_v51, 4 }
 0x171   :  { %v537_v63 = vsel %vm536_vm11, %v421_v44, %v414_v55  ;;  %v500_v1 = vrot.slane %v499_v59, 4  ;;  %v371_v3 = vrot.slane %v357_v46, %v3021_v53  ;;  %v372_v4 = vcombine.high %v364_v56, %v364_v56 }
 0x172   :  { %v513_v2 = vsel %vm407_vm10, %v390_v58, -inf  ;;  %v459_v6 = vmax.f32 %v457_v32, %v458_v43  ;;  %v507_v8 = vrot.slane %v506_v60, 4  ;;  %v447_v9 = vmax.f32 %v445_v36, %v446_v54 }
 0x173   :  { %v514_v10 = vrot.slane %v513_v2, 4  ;;  %v373_v11 = vcombine.high %v371_v3, %v371_v3  ;;  %v464_v12 = vsel %vm407_vm10, %v364_v56, -inf  ;;  %v454_v7 = vmax.f32 %v452_v39, %v453_v57 }
 0x174   :  { %v435_v13 = vmax.f32 %v433_v47, %v434_v62  ;;  %v539_v14 = vsel %vm538_vm12, %v428_v61, %v537_v63  ;;  %v494_v15 = vmax.f32 %v492_v51, %v493_v0  ;;  %v501_v16 = vmax.f32 %v499_v59, %v500_v1 }
 0x175   :  { %v465_v17 = vrot.slane %v464_v12, 4  ;;  %v471_v18 = vsel %vm407_vm10, %v372_v4, -inf  ;;  %v478_v19 = vsel %vm407_vm10, %v371_v3, -inf  ;;  %v442_v20 = vmax.f32 %v440_v52, %v441_v5 }
 0x176   :  { %v460_v21 = vrot.slane %v459_v6, 2  ;;  %v508_v22 = vmax.f32 %v506_v60, %v507_v8  ;;  %v472_v23 = vrot.slane %v471_v18, 4  ;;  %v515_v24 = vmax.f32 %v513_v2, %v514_v10 }
 0x177   :  { %v466_v26 = vmax.f32 %v464_v12, %v465_v17  ;;  %v479_v27 = vrot.slane %v478_v19, 4  ;;  %v485_v28 = vsel %vm407_vm10, %v373_v11, -inf  ;;  %v448_v29 = vrot.slane %v447_v9, 1 }
 0x178   :  { %v541_v30 = vsel %vm540_vm13, %v435_v13, %v539_v14  ;;  %v495_v31 = vrot.slane %v494_v15, 2  ;;  %v473_v32 = vmax.f32 %v471_v18, %v472_v23  ;;  %v502_v33 = vrot.slane %v501_v16, 2 }
 0x179   :  { %v467_v34 = vrot.slane %v466_v26, 2  ;;  %v480_v35 = vmax.f32 %v478_v19, %v479_v27  ;;  %v486_v36 = vrot.slane %v485_v28, 4  ;;  %v455_v37 = vrot.slane %v454_v7, 1 }
 0x17a   :  { %v461_v38 = vmax.f32 %v459_v6, %v460_v21  ;;  %v509_v39 = vrot.slane %v508_v22, 2  ;;  %v474_v40 = vrot.slane %v473_v32, 2  ;;  %v516_v41 = vrot.slane %v515_v24, 2 }
 0x17b   :  { %v468_v42 = vmax.f32 %v466_v26, %v467_v34  ;;  %v481_v43 = vrot.slane %v480_v35, 2  ;;  %v487_v44 = vmax.f32 %v485_v28, %v486_v36  ;;  %v449_v45 = vmax.f32 %v447_v9, %v448_v29 }
 0x17c   :  { %v543_v47 = vsel %vm542_vm14, %v442_v20, %v541_v30  ;;  %v496_v49 = vmax.f32 %v494_v15, %v495_v31  ;;  %v475_v50 = vmax.f32 %v473_v32, %v474_v40  ;;  %v503_v51 = vmax.f32 %v501_v16, %v502_v33 }
 0x17d   :  { %v469_v46 = vrot.slane %v468_v42, 1  ;;  %v482_v52 = vmax.f32 %v480_v35, %v481_v43  ;;  %v488_v54 = vrot.slane %v487_v44, 2  ;;  %v462_v55 = vrot.slane %v461_v38, 1 }
 0x17e   :  { %v510_v56 = vmax.f32 %v508_v22, %v509_v39  ;;  %v476_v57 = vrot.slane %v475_v50, 1  ;;  %v545_v58 = vsel %vm544_vm15, %v449_v45, %v543_v47  ;;  %v517_v59 = vmax.f32 %v515_v24, %v516_v41 }
 0x17f   :  { %v483_v60 = vrot.slane %v482_v52, 1  ;;  %v489_v61 = vmax.f32 %v487_v44, %v488_v54  ;;  %v456_v62 = vmax.f32 %v454_v7, %v455_v37  ;;  %v497_v63 = vrot.slane %v496_v49, 1  ;;  %v655_v54 = vld [vmem:[#allocation5 + $0xf0] sm:$0xff] }
 0x180   :  { %v470_v0 = vmax.f32 %v468_v42, %v469_v46  ;;  %v477_v1 = vmax.f32 %v475_v50, %v476_v57  ;;  %v504_v2 = vrot.slane %v503_v51, 1  ;;  %v511_v6 = vrot.slane %v510_v56, 1  ;;  %v652_v57 = vld [vmem:[#allocation5 + $0xd8] sm:$0xff] }
 0x181   :  { %v484_v3 = vmax.f32 %v482_v52, %v483_v60  ;;  %v490_v4 = vrot.slane %v489_v61, 1  ;;  %v547_v5 = vsel %vm546_vm2, %v456_v62, %v545_v58  ;;  %v2860_v9 = vmov 1934713408   ;;  %v651_v58 = vld [vmem:[#allocation5 + $0xd0] sm:$0xff]  ;;  %v644_v62 = vld [vmem:[#allocation5 + $0x98] sm:$0xff] }
 0x182   :  { %v550_v8 = vsel %vm536_vm11, %v477_v1, %v470_v0  ;;  %v592_v10 = vunpack.c.l.s4 %v2860_v9  ;;  %v463_v11 = vmax.f32 %v461_v38, %v462_v55  ;;  %v518_v12 = vrot.slane %v517_v59, 1  ;;  %v640_v0 = vld [vmem:[#allocation5 + $0x78] sm:$0xff] }
 0x183   :  { %v491_v13 = vmax.f32 %v489_v61, %v490_v4  ;;  %v551_v14 = vsel %vm538_vm12, %v484_v3, %v550_v8  ;;  %v498_v7 = vmax.f32 %v496_v49, %v497_v63  ;;  %v505_v16 = vmax.f32 %v503_v51, %v504_v2  ;;  %v647_v61 = vld [vmem:[#allocation5 + $0xb0] sm:$0xff]  ;;  %v636_v1 = vld [vmem:[#allocation5 + $0x58] sm:$0xff] }
 0x184   :  { %v549_v15 = vsel %vm548_vm4, %v463_v11, %v547_v5  ;;  %v512_v18 = vmax.f32 %v510_v56, %v511_v6  ;;  %v593_v20 = vunpack.c.0.s8 %v592_v10  ;;  %v519_v21 = vmax.f32 %v517_v59, %v518_v12  ;;  %v648_v59 = vld [vmem:[#allocation5 + $0xb8] sm:$0xff]  ;;  %v643_v63 = vld [vmem:[#allocation5 + $0x90] sm:$0xff] }
 0x185   :  { %v552_v17 = vsel %vm540_vm13, %v491_v13, %v551_v14  ;;  %v559_v24 = vcombine.high %v549_v15, %v4010_v25  ;;  %v566_v27 = vrot.slane %v549_v15, %v3021_v53  ;;  %v635_v2 = vld [vmem:[#allocation5 + $0x50] sm:$0xff]  ;;  %v632_v3 = vld [vmem:[#allocation5 + $0x38] sm:$0xff] }
 0x186   :  { %v553_v19 = vsel %vm542_vm14, %v498_v7, %v552_v17  ;;  %v596_v29 = vsub.s32 %v593_v20, %v3018_v48  ;;  %v631_v4 = vld [vmem:[#allocation5 + $0x30] sm:$0xff]  ;;  %v628_v5 = vld [vmem:[#allocation5 + $0x18] sm:$0xff] }
 0x187   :  { %v554_v22 = vsel %vm544_vm15, %v505_v16, %v553_v19  ;;  %v573_v33 = vrot.slane %v559_v24, %v3021_v53  ;;  %v627_v6 = vld [vmem:[#allocation5 + $0x10] sm:$0xff] }
 0x188   :  { %v555_v23 = vsel %vm546_vm2, %v512_v18, %v554_v22 }
 0x189   :  { %v556_v26 = vsel %vm548_vm4, %v519_v21, %v555_v23 }
 0x18a   :  { %v581_v28 = vrot.slane %v556_v26, %v3021_v53  ;;  %v574_v30 = vcombine.high %v556_v26, %v4010_v25 }
 0x18c   :  { %v589_v31 = vcombine.low %v566_v27, %v581_v28  ;;  %v590_v32 = vcombine.high %v566_v27, %v581_v28  ;;  %v588_v34 = vrot.slane %v574_v30, %v3021_v53 }
 0x18e   :  { %v597_v35 = vrot.slane %v589_v31, %v596_v29  ;;  %v604_v36 = vrot.slane %v590_v32, %v596_v29  ;;  %v605_v37 = vcombine.low %v573_v33, %v588_v34  ;;  %v606_v38 = vcombine.high %v573_v33, %v588_v34 }
 0x190   :  { %v621_v39 = vcombine.high %v597_v35, %v4010_v25  ;;  %v622_v40 = vcombine.high %v604_v36, %v4010_v25  ;;  %v613_v41 = vrot.slane %v605_v37, %v596_v29  ;;  %v620_v42 = vrot.slane %v606_v38, %v596_v29 }
 0x192   :  { %v687_v43 = vcombine.low %v597_v35, %v621_v39  ;;  %v688_v44 = vcombine.low %v604_v36, %v622_v40  ;;  %v623_v45 = vcombine.high %v613_v41, %v4010_v25  ;;  %v624_v47 = vcombine.high %v620_v42, %v4010_v25 }
 0x194   :  { %v695_v49 = vrot.slane %v687_v43, %v3021_v53  ;;  %v702_v50 = vrot.slane %v688_v44, %v3021_v53  ;;  %v704_v51 = vcombine.low %v613_v41, %v623_v45  ;;  %v705_v46 = vcombine.low %v620_v42, %v624_v47 }
 0x196   :  { %v703_v52 = vcombine.low %v695_v49, %v702_v50  ;;  %v712_v55 = vrot.slane %v704_v51, %v3021_v53  ;;  %v719_v56 = vrot.slane %v705_v46, %v3021_v53  ;;  %v639_v53 = vld [vmem:[#allocation5 + $0x70] sm:$0xff] }
 0x198   :  { %2575 = vmatmul.mubr.msk.f32.vlgmr.msra.gmra.mxu0 %vm721_vm5, %v703_v52  ;;  %v720_v60 = vcombine.low %v712_v55, %v719_v56 }
 0x199   :  { %820 = vmatpush1.msra.mxu0 %v655_v54  ;;  %796 = vmatprep.mubr.f32.mxu0 %v4010_v25 }
 0x19a   :  { %821 = vmatprep.subr.mxu0 %v652_v57 }
 0x19b   :  { %822 = vmatpush1.msra.mxu0 %v651_v58 }
 0x19c   :  { %823 = vmatprep.subr.mxu0 %v648_v59  ;;  %2576 = vmatmul.mubr.msk.f32.gmra.mxu0 %vm721_vm5, %v720_v60 }
 0x19d   :  { %824 = vmatpush1.msra.mxu0 %v647_v61  ;;  %867 = vmatprep.mubr.f32.mxu0 %v4010_v25 }
 0x19e   :  { %825 = vmatprep.subr.mxu0 %v644_v62 }
 0x19f   :  { %826 = vmatpush1.msra.mxu0 %v643_v63 }
 0x1a0   :  { %827 = vmatprep.subr.mxu0 %v640_v0 }
 0x1a1   :  { %828 = vmatpush1.msra.mxu0 %v639_v53 }
 0x1a2   :  { %829 = vmatprep.subr.mxu0 %v636_v1 }
 0x1a3   :  { %830 = vmatpush1.msra.mxu0 %v635_v2 }
 0x1a4   :  { %831 = vmatprep.subr.mxu0 %v632_v3 }
 0x1a5   :  { %832 = vmatpush1.msra.mxu0 %v631_v4 }
 0x1a6   :  { %833 = vmatprep.subr.mxu0 %v628_v5 }
 0x1a7   :  { %834 = vmatpush1.msra.mxu0 %v627_v6 }
 0x1a8   :  { %2577 = vmatmul.mubr.msk.f32.vlgmr.msra.gmra.mxu0 %vm721_vm5, %v703_v52 }
 0x1a9   :  { %873 = vmatprep.mubr.f32.mxu0 %v4010_v25 }
 0x1ac   :  { %2578 = vmatmul.mubr.msk.f32.gmra.mxu0 %vm721_vm5, %v720_v60 }
 0x1ad   :  { %2802 = shalt.err (!%p2799_p9)  }
 0x1ae   :  { %50 = dma.hbm_to_vmem [thread:$0]  %s4006_s5, 8192, %s48_s29, [#allocation4] }
 0x1af   :  { %s2811_s13 = scalar_lea.vmem %s60_s9, 2048  ;;  %p2816_p11 = scmp.lt.s32.totalorder %s60_s9, %s60_s9 }
 0x1b0   :  { %p2812_p10 = scmp.ne.s32.totalorder %s60_s9, %s2811_s13  ;;  %p2817_p12 = scmp.lt.s32.totalorder %s2811_s13, %s2811_s13 }
 0x1b2   :  { %p2818_p13 = por %p2817_p12, %p2816_p11 }
 0x1b4   :  { %p2819_p0 = pnand %p2818_p13, %p2812_p10 }
 0x1b6   :  { %2822 = shalt.err (!%p2819_p0)  }
 0x1b7   :  { %62 = dma.hbm_to_vmem [thread:$0]  %s4007_s6, 2048, %s60_s9, [#allocation4 + $0x1]  ;;  %v661_v8 = vsub.s32 0, %v3018_v48  ;;  %v657_v9 = vld [vmem:[%s4005_s4] sm:$0xf]  ;;  %v665_v10 = vsub.s32 1, %v3018_v48 }
 0x1b8   :  { %v669_v20 = vsub.s32 2, %v3018_v48  ;;  %v673_v21 = vsub.s32 3, %v3018_v48 }
 0x1b9   :  { %v662_v11 = vrot.slane %v657_v9, %v661_v8  ;;  %v666_v12 = vrot.slane %v657_v9, %v665_v10 }
 0x1ba   :  { %v670_v22 = vrot.slane %v657_v9, %v669_v20  ;;  %v674_v23 = vrot.slane %v657_v9, %v673_v21 }
 0x258   :  { %v792_v13 = vpop.f32.mrf.mxu0 }
 0x259   :  { %v3094_v14 = vadd.f32 %v792_v13, %v662_v11 }
 0x25a   :  { %v794_v7 = vpop.f32.mrf.mxu0 }
 0x25b   :  { %4091 = vst [vmem:[#allocation19_spill] sm:$0xff] %v3094_v14  ;;  %v3096_v15 = vadd.f32 %v794_v7, %v666_v12 }
 0x25c   :  { %v798_v16 = vpop.f32.mrf.mxu0 }
 0x25d   :  { %4092 = vst [vmem:[#allocation20_spill] sm:$0xff] %v3096_v15  ;;  %v3098_v17 = vadd.f32 %v798_v16, %v662_v11 }
 0x25e   :  { %v800_v18 = vpop.f32.mrf.mxu0 }
 0x25f   :  { %4093 = vst [vmem:[#allocation21_spill] sm:$0xff] %v3098_v17  ;;  %v3100_v19 = vadd.f32 %v800_v18, %v666_v12 }
 0x261   :  { %4094 = vst [vmem:[#allocation22_spill] sm:$0xff] %v3100_v19 }
 0x268   :  { %v869_v24 = vpop.f32.mrf.mxu0 }
 0x269   :  { %v3104_v26 = vadd.f32 %v869_v24, %v670_v22 }
 0x26a   :  { %v871_v27 = vpop.f32.mrf.mxu0 }
 0x26b   :  { %4095 = vst [vmem:[#allocation23_spill] sm:$0xff] %v3104_v26  ;;  %v3106_v28 = vadd.f32 %v871_v27, %v674_v23 }
 0x26c   :  { %v875_v29 = vpop.f32.mrf.mxu0 }
 0x26d   :  { %4096 = vst [vmem:[#allocation24_spill] sm:$0xff] %v3106_v28  ;;  %v3108_v30 = vadd.f32 %v875_v29, %v670_v22 }
 0x26e   :  { %v877_v31 = vpop.f32.mrf.mxu0 }
 0x26f   :  { %4097 = vst [vmem:[#allocation25_spill] sm:$0xff] %v3108_v30  ;;  %v3110_v32 = vadd.f32 %v877_v31, %v674_v23 }
 0x271   :  { %4098 = vst [vmem:[#allocation26_spill] sm:$0xff] %v3110_v32 }
 0x272   :  { %2845 = dma.done.wait [#allocation4], 8192 }
 0x273   :  { %2846 = vsyncadd [#allocation4], 4294959104  ;;  %1012 = vmatprep.mubr.f32.mxu1 %v4010_v25  ;;  %1083 = vmatprep.mubr.f32.mxu0 %v4010_v25  ;;  %v3114_v48 = vld [vmem:[#allocation2 + $0x1e8] sm:$0xff]  ;;  %v3116_v33 = vld [vmem:[#allocation2 + $0x1f8] sm:$0xff] }
 0x274   :  { %4099 = vst [vmem:[#allocation27_spill] sm:$0xff] %v3114_v48  ;;  %4100 = vst [vmem:[#allocation28_spill] sm:$0xff] %v3116_v33  ;;  %v3118_v34 = vld [vmem:[#allocation2 + $0x1e0] sm:$0xff]  ;;  %948 = vmatprep.subr.mxu1 %v3114_v48  ;;  %1019 = vmatprep.subr.mxu0 %v3116_v33  ;;  %v3122_v35 = vld [vmem:[#allocation2 + $0x1f0] sm:$0xff] }
 0x275   :  { %v3124_v36 = vld [vmem:[#allocation2 + $0x1c8] sm:$0xff]  ;;  %v3126_v37 = vld [vmem:[#allocation2 + $0x1d8] sm:$0xff]  ;;  %949 = vmatpush1.msra.mxu1 %v3118_v34  ;;  %1020 = vmatpush1.msra.mxu0 %v3122_v35  ;;  %v3130_v38 = vld [vmem:[#allocation2 + $0x1c0] sm:$0xff] }
 0x276   :  { %v3132_v39 = vld [vmem:[#allocation2 + $0x1d0] sm:$0xff]  ;;  %v3134_v40 = vld [vmem:[#allocation2 + $0x1a8] sm:$0xff]  ;;  %950 = vmatprep.subr.mxu1 %v3124_v36  ;;  %1021 = vmatprep.subr.mxu0 %v3126_v37  ;;  %v3138_v41 = vld [vmem:[#allocation2 + $0x1b8] sm:$0xff] }
 0x277   :  { %v3140_v42 = vld [vmem:[#allocation2 + $0x1a0] sm:$0xff]  ;;  %v3142_v43 = vld [vmem:[#allocation2 + $0x1b0] sm:$0xff]  ;;  %951 = vmatpush1.msra.mxu1 %v3130_v38  ;;  %1022 = vmatpush1.msra.mxu0 %v3132_v39  ;;  %v3146_v44 = vld [vmem:[#allocation2 + $0x188] sm:$0xff] }
 0x278   :  { %v3148_v45 = vld [vmem:[#allocation2 + $0x198] sm:$0xff]  ;;  %952 = vmatprep.subr.mxu1 %v3134_v40  ;;  %1023 = vmatprep.subr.mxu0 %v3138_v41  ;;  %v3152_v47 = vld [vmem:[#allocation2 + $0x180] sm:$0xff]  ;;  %v3154_v49 = vld [vmem:[#allocation2 + $0x190] sm:$0xff] }
 0x279   :  { %953 = vmatpush1.msra.mxu1 %v3140_v42  ;;  %1024 = vmatpush1.msra.mxu0 %v3142_v43  ;;  %v3158_v50 = vld [vmem:[#allocation2 + $0x168] sm:$0xff]  ;;  %v3160_v51 = vld [vmem:[#allocation2 + $0x178] sm:$0xff]  ;;  %v3164_v46 = vld [vmem:[#allocation2 + $0x160] sm:$0xff] }
 0x27a   :  { %954 = vmatprep.subr.mxu1 %v3146_v44  ;;  %1025 = vmatprep.subr.mxu0 %v3148_v45  ;;  %v3166_v52 = vld [vmem:[#allocation2 + $0x170] sm:$0xff]  ;;  %v3170_v54 = vld [vmem:[#allocation2 + $0x148] sm:$0xff]  ;;  %v3172_v55 = vld [vmem:[#allocation2 + $0x158] sm:$0xff] }
 0x27b   :  { %955 = vmatpush1.msra.mxu1 %v3152_v47  ;;  %1026 = vmatpush1.msra.mxu0 %v3154_v49  ;;  %v3176_v56 = vld [vmem:[#allocation2 + $0x140] sm:$0xff]  ;;  %v3178_v57 = vld [vmem:[#allocation2 + $0x150] sm:$0xff]  ;;  %v3182_v58 = vld [vmem:[#allocation2 + $0x128] sm:$0xff] }
 0x27c   :  { %956 = vmatprep.subr.mxu1 %v3158_v50  ;;  %1027 = vmatprep.subr.mxu0 %v3160_v51  ;;  %v3184_v59 = vld [vmem:[#allocation2 + $0x138] sm:$0xff]  ;;  %v3188_v60 = vld [vmem:[#allocation2 + $0x120] sm:$0xff]  ;;  %v3190_v61 = vld [vmem:[#allocation2 + $0x130] sm:$0xff] }
 0x27d   :  { %957 = vmatpush1.msra.mxu1 %v3164_v46  ;;  %1028 = vmatpush1.msra.mxu0 %v3166_v52  ;;  %v3194_v62 = vld [vmem:[#allocation2 + $0x108] sm:$0xff]  ;;  %v3196_v63 = vld [vmem:[#allocation2 + $0x118] sm:$0xff]  ;;  %v3200_v0 = vld [vmem:[#allocation2 + $0x100] sm:$0xff] }
 0x27e   :  { %958 = vmatprep.subr.mxu1 %v3170_v54  ;;  %1029 = vmatprep.subr.mxu0 %v3172_v55  ;;  %v3202_v53 = vld [vmem:[#allocation2 + $0x110] sm:$0xff]  ;;  %v3206_v1 = vld [vmem:[#allocation2 + $0xe8] sm:$0xff]  ;;  %v3208_v2 = vld [vmem:[#allocation2 + $0xf8] sm:$0xff] }
 0x27f   :  { %959 = vmatpush1.msra.mxu1 %v3176_v56  ;;  %1030 = vmatpush1.msra.mxu0 %v3178_v57  ;;  %v3212_v3 = vld [vmem:[#allocation2 + $0xe0] sm:$0xff]  ;;  %v3214_v4 = vld [vmem:[#allocation2 + $0xf0] sm:$0xff]  ;;  %v3218_v5 = vld [vmem:[#allocation2 + $0xc8] sm:$0xff] }
 0x280   :  { %960 = vmatprep.subr.mxu1 %v3182_v58  ;;  %1031 = vmatprep.subr.mxu0 %v3184_v59  ;;  %v3220_v6 = vld [vmem:[#allocation2 + $0xd8] sm:$0xff]  ;;  %v3224_v8 = vld [vmem:[#allocation2 + $0xc0] sm:$0xff]  ;;  %v3226_v9 = vld [vmem:[#allocation2 + $0xd0] sm:$0xff] }
 0x281   :  { %961 = vmatpush1.msra.mxu1 %v3188_v60  ;;  %1032 = vmatpush1.msra.mxu0 %v3190_v61  ;;  %v3230_v10 = vld [vmem:[#allocation2 + $0xa8] sm:$0xff]  ;;  %v3232_v11 = vld [vmem:[#allocation2 + $0xb8] sm:$0xff]  ;;  %v3236_v12 = vld [vmem:[#allocation2 + $0xa0] sm:$0xff] }
 0x282   :  { %962 = vmatprep.subr.mxu1 %v3194_v62  ;;  %1033 = vmatprep.subr.mxu0 %v3196_v63  ;;  %v3238_v13 = vld [vmem:[#allocation2 + $0xb0] sm:$0xff]  ;;  %v3242_v7 = vld [vmem:[#allocation2 + $0x88] sm:$0xff]  ;;  %v3244_v16 = vld [vmem:[#allocation2 + $0x98] sm:$0xff] }
 0x283   :  { %963 = vmatpush1.msra.mxu1 %v3200_v0  ;;  %1034 = vmatpush1.msra.mxu0 %v3202_v53  ;;  %4101 = vst [vmem:[#allocation29_spill] sm:$0xff] %v3242_v7  ;;  %4102 = vst [vmem:[#allocation30_spill] sm:$0xff] %v3244_v16  ;;  %v3248_v18 = vld [vmem:[#allocation2 + $0x80] sm:$0xff]  ;;  %v3250_v20 = vld [vmem:[#allocation2 + $0x90] sm:$0xff] }
 0x284   :  { %964 = vmatprep.subr.mxu1 %v3206_v1  ;;  %1035 = vmatprep.subr.mxu0 %v3208_v2  ;;  %4103 = vst [vmem:[#allocation31_spill] sm:$0xff] %v3248_v18  ;;  %4104 = vst [vmem:[#allocation32_spill] sm:$0xff] %v3250_v20  ;;  %v3254_v21 = vld [vmem:[#allocation2 + $0x68] sm:$0xff]  ;;  %v3256_v22 = vld [vmem:[#allocation2 + $0x78] sm:$0xff] }
 0x285   :  { %965 = vmatpush1.msra.mxu1 %v3212_v3  ;;  %1036 = vmatpush1.msra.mxu0 %v3214_v4  ;;  %4105 = vst [vmem:[#allocation33_spill] sm:$0xff] %v3254_v21  ;;  %4106 = vst [vmem:[#allocation34_spill] sm:$0xff] %v3256_v22  ;;  %v3260_v23 = vld [vmem:[#allocation2 + $0x60] sm:$0xff]  ;;  %v3262_v24 = vld [vmem:[#allocation2 + $0x70] sm:$0xff] }
 0x286   :  { %966 = vmatprep.subr.mxu1 %v3218_v5  ;;  %1037 = vmatprep.subr.mxu0 %v3220_v6  ;;  %4107 = vst [vmem:[#allocation35_spill] sm:$0xff] %v3260_v23  ;;  %4108 = vst [vmem:[#allocation36_spill] sm:$0xff] %v3262_v24  ;;  %v3266_v27 = vld [vmem:[#allocation2 + $0x48] sm:$0xff]  ;;  %v3268_v29 = vld [vmem:[#allocation2 + $0x58] sm:$0xff] }
 0x287   :  { %967 = vmatpush1.msra.mxu1 %v3224_v8  ;;  %1038 = vmatpush1.msra.mxu0 %v3226_v9  ;;  %4109 = vst [vmem:[#allocation37_spill] sm:$0xff] %v3266_v27  ;;  %4110 = vst [vmem:[#allocation38_spill] sm:$0xff] %v3268_v29  ;;  %v3272_v31 = vld [vmem:[#allocation2 + $0x40] sm:$0xff]  ;;  %v3274_v25 = vld [vmem:[#allocation2 + $0x50] sm:$0xff] }
 0x288   :  { %968 = vmatprep.subr.mxu1 %v3230_v10  ;;  %1039 = vmatprep.subr.mxu0 %v3232_v11  ;;  %4111 = vst [vmem:[#allocation39_spill] sm:$0xff] %v3272_v31  ;;  %4112 = vst [vmem:[#allocation40_spill] sm:$0xff] %v3274_v25  ;;  %v3278_v17 = vld [vmem:[#allocation2 + $0x28] sm:$0xff]  ;;  %v3280_v32 = vld [vmem:[#allocation2 + $0x38] sm:$0xff] }
 0x289   :  { %969 = vmatpush1.msra.mxu1 %v3236_v12  ;;  %1040 = vmatpush1.msra.mxu0 %v3238_v13  ;;  %4113 = vst [vmem:[#allocation41_spill] sm:$0xff] %v3278_v17  ;;  %4114 = vst [vmem:[#allocation42_spill] sm:$0xff] %v3280_v32  ;;  %v3284_v19 = vld [vmem:[#allocation2 + $0x20] sm:$0xff]  ;;  %v3286_v30 = vld [vmem:[#allocation2 + $0x30] sm:$0xff] }
 0x28a   :  { %970 = vmatprep.subr.mxu1 %v3242_v7  ;;  %1041 = vmatprep.subr.mxu0 %v3244_v16  ;;  %4115 = vst [vmem:[#allocation43_spill] sm:$0xff] %v3284_v19  ;;  %4116 = vst [vmem:[#allocation44_spill] sm:$0xff] %v3286_v30  ;;  %v3290_v14 = vld [vmem:[#allocation2 + $0x8] sm:$0xff]  ;;  %v3292_v28 = vld [vmem:[#allocation2 + $0x18] sm:$0xff] }
 0x28b   :  { %971 = vmatpush1.msra.mxu1 %v3248_v18  ;;  %1042 = vmatpush1.msra.mxu0 %v3250_v20  ;;  %4117 = vst [vmem:[#allocation45_spill] sm:$0xff] %v3290_v14  ;;  %4118 = vst [vmem:[#allocation46_spill] sm:$0xff] %v3292_v28  ;;  %v3296_v15 = vld [vmem:[#allocation2] sm:$0xff]  ;;  %v3298_v26 = vld [vmem:[#allocation2 + $0x10] sm:$0xff] }
 0x28c   :  { %972 = vmatprep.subr.mxu1 %v3254_v21  ;;  %1043 = vmatprep.subr.mxu0 %v3256_v22  ;;  %4119 = vst [vmem:[#allocation47_spill] sm:$0xff] %v3296_v15  ;;  %4120 = vst [vmem:[#allocation48_spill] sm:$0xff] %v3298_v26 }
 0x28d   :  { %973 = vmatpush1.msra.mxu1 %v3260_v23  ;;  %1044 = vmatpush1.msra.mxu0 %v3262_v24 }
 0x28e   :  { %974 = vmatprep.subr.mxu1 %v3266_v27  ;;  %1045 = vmatprep.subr.mxu0 %v3268_v29 }
 0x28f   :  { %975 = vmatpush1.msra.mxu1 %v3272_v31  ;;  %1046 = vmatpush1.msra.mxu0 %v3274_v25  ;;  %v4121_v25 = vmov 0.0  }
 0x290   :  { %976 = vmatprep.subr.mxu1 %v3278_v17  ;;  %1047 = vmatprep.subr.mxu0 %v3280_v32 }
 0x291   :  { %977 = vmatpush1.msra.mxu1 %v3284_v19  ;;  %1048 = vmatpush1.msra.mxu0 %v3286_v30 }
 0x292   :  { %978 = vmatprep.subr.mxu1 %v3290_v14  ;;  %1049 = vmatprep.subr.mxu0 %v3292_v28 }
 0x293   :  { %979 = vmatpush1.msra.mxu1 %v3296_v15  ;;  %1050 = vmatpush1.msra.mxu0 %v3298_v26 }
 0x294   :  { %1013 = vmatmul.mubr.f32.vlgmr.msra.gmra.mxu1 %v4121_v25  ;;  %1084 = vmatmul.mubr.f32.vlgmr.msra.gmra.mxu0 %v4121_v25 }
 0x295   :  { %1126 = vmatprep.subr.mxu1 %v3114_v48  ;;  %1197 = vmatprep.subr.mxu0 %v3116_v33 }
 0x296   :  { %1127 = vmatpush1.msra.mxu1 %v3118_v34  ;;  %1198 = vmatpush1.msra.mxu0 %v3122_v35 }
 0x297   :  { %1128 = vmatprep.subr.mxu1 %v3124_v36  ;;  %1199 = vmatprep.subr.mxu0 %v3126_v37 }
 0x298   :  { %1129 = vmatpush1.msra.mxu1 %v3130_v38  ;;  %1200 = vmatpush1.msra.mxu0 %v3132_v39 }
 0x299   :  { %1130 = vmatprep.subr.mxu1 %v3134_v40  ;;  %1201 = vmatprep.subr.mxu0 %v3138_v41 }
 0x29a   :  { %1131 = vmatpush1.msra.mxu1 %v3140_v42  ;;  %1202 = vmatpush1.msra.mxu0 %v3142_v43 }
 0x29b   :  { %1132 = vmatprep.subr.mxu1 %v3146_v44  ;;  %1203 = vmatprep.subr.mxu0 %v3148_v45 }
 0x29c   :  { %1133 = vmatpush1.msra.mxu1 %v3152_v47  ;;  %1204 = vmatpush1.msra.mxu0 %v3154_v49 }
 0x29d   :  { %1134 = vmatprep.subr.mxu1 %v3158_v50  ;;  %1205 = vmatprep.subr.mxu0 %v3160_v51 }
 0x29e   :  { %1135 = vmatpush1.msra.mxu1 %v3164_v46  ;;  %1206 = vmatpush1.msra.mxu0 %v3166_v52 }
 0x29f   :  { %1136 = vmatprep.subr.mxu1 %v3170_v54  ;;  %1207 = vmatprep.subr.mxu0 %v3172_v55 }
 0x2a0   :  { %1137 = vmatpush1.msra.mxu1 %v3176_v56  ;;  %1208 = vmatpush1.msra.mxu0 %v3178_v57 }
 0x2a1   :  { %1138 = vmatprep.subr.mxu1 %v3182_v58  ;;  %1209 = vmatprep.subr.mxu0 %v3184_v59 }
 0x2a2   :  { %1139 = vmatpush1.msra.mxu1 %v3188_v60  ;;  %1210 = vmatpush1.msra.mxu0 %v3190_v61 }
 0x2a3   :  { %1140 = vmatprep.subr.mxu1 %v3194_v62  ;;  %1211 = vmatprep.subr.mxu0 %v3196_v63 }
 0x2a4   :  { %1141 = vmatpush1.msra.mxu1 %v3200_v0  ;;  %1212 = vmatpush1.msra.mxu0 %v3202_v53 }
 0x2a5   :  { %1142 = vmatprep.subr.mxu1 %v3206_v1  ;;  %1213 = vmatprep.subr.mxu0 %v3208_v2 }
 0x2a6   :  { %1143 = vmatpush1.msra.mxu1 %v3212_v3  ;;  %1214 = vmatpush1.msra.mxu0 %v3214_v4 }
 0x2a7   :  { %1144 = vmatprep.subr.mxu1 %v3218_v5  ;;  %1215 = vmatprep.subr.mxu0 %v3220_v6 }
 0x2a8   :  { %1145 = vmatpush1.msra.mxu1 %v3224_v8  ;;  %1216 = vmatpush1.msra.mxu0 %v3226_v9 }
 0x2a9   :  { %1146 = vmatprep.subr.mxu1 %v3230_v10  ;;  %1217 = vmatprep.subr.mxu0 %v3232_v11 }
 0x2aa   :  { %1147 = vmatpush1.msra.mxu1 %v3236_v12  ;;  %1218 = vmatpush1.msra.mxu0 %v3238_v13 }
 0x2ab   :  { %1148 = vmatprep.subr.mxu1 %v3242_v7  ;;  %1219 = vmatprep.subr.mxu0 %v3244_v16  ;;  %v4122_v7 = vld [vmem:[#allocation40_spill] sm:$0xff] }
 0x2ac   :  { %1149 = vmatpush1.msra.mxu1 %v3248_v18  ;;  %1220 = vmatpush1.msra.mxu0 %v3250_v20 }
 0x2ad   :  { %1150 = vmatprep.subr.mxu1 %v3254_v21  ;;  %1221 = vmatprep.subr.mxu0 %v3256_v22 }
 0x2ae   :  { %1151 = vmatpush1.msra.mxu1 %v3260_v23  ;;  %1222 = vmatpush1.msra.mxu0 %v3262_v24  ;;  %v4126_v24 = vld [vmem:[#allocation19_spill] sm:$0xff] }
 0x2af   :  { %1152 = vmatprep.subr.mxu1 %v3266_v27  ;;  %1223 = vmatprep.subr.mxu0 %v3268_v29  ;;  %v4125_v29 = vld [vmem:[#allocation24_spill] sm:$0xff] }
 0x2b0   :  { %1153 = vmatpush1.msra.mxu1 %v3272_v31  ;;  %1224 = vmatpush1.msra.mxu0 %v4122_v7  ;;  %v4124_v31 = vld [vmem:[#allocation20_spill] sm:$0xff] }
 0x2b1   :  { %1154 = vmatprep.subr.mxu1 %v3278_v17  ;;  %1225 = vmatprep.subr.mxu0 %v3280_v32  ;;  %v4123_v17 = vld [vmem:[#allocation23_spill] sm:$0xff] }
 0x2b2   :  { %1155 = vmatpush1.msra.mxu1 %v3284_v19  ;;  %1226 = vmatpush1.msra.mxu0 %v3286_v30 }
 0x2b3   :  { %1156 = vmatprep.subr.mxu1 %v3290_v14  ;;  %1227 = vmatprep.subr.mxu0 %v3292_v28 }
 0x2b4   :  { %1157 = vmatpush1.msra.mxu1 %v3296_v15  ;;  %1190 = vmatprep.mubr.f32.mxu1 %v4121_v25 }
 0x2b5   :  { %1228 = vmatpush1.msra.mxu0 %v3298_v26  ;;  %1261 = vmatprep.mubr.f32.mxu0 %v4121_v25 }
 0x2b6   :  { %1316 = vmatprep.subr.mxu1 %v3114_v48  ;;  %1387 = vmatprep.subr.mxu0 %v3116_v33 }
 0x354   :  { %v1014_v32 = vpop.f32.mrf.mxu1  ;;  %v1085_v19 = vpop.f32.mrf.mxu0 }
 0x355   :  { %v1092_v30 = vadd.f32 %v1085_v19, %v4123_v17  ;;  %v1090_v23 = vadd.f32 %v1014_v32, %v4126_v24  ;;  %v4129_v32 = vld [vmem:[#allocation32_spill] sm:$0xff] }
 0x356   :  { %v1016_v7 = vpop.f32.mrf.mxu1  ;;  %v1087_v14 = vpop.f32.mrf.mxu0 }
 0x357   :  { %v1091_v28 = vadd.f32 %v1016_v7, %v4124_v31  ;;  %v1093_v15 = vadd.f32 %v1087_v14, %v4125_v29  ;;  %v1098_v27 = vrot.slane %v1092_v30, 4 }
 0x359   :  { %v1095_v26 = vrot.slane %v1091_v28, 6  ;;  %v1101_v22 = vrot.slane %v1093_v15, 2 }
 0x35b   :  { %v1103_v25 = vsel %vm71_vm0, %v1090_v23, %v1095_v26  ;;  %v4136_v23 = vld [vmem:[#allocation39_spill] sm:$0xff] }
 0x35c   :  { %v1104_v48 = vsel %vm161_vm3, %v1103_v25, %v1098_v27  ;;  %v4127_v25 = vld [vmem:[#allocation29_spill] sm:$0xff]  ;;  %v4137_v27 = vld [vmem:[#allocation40_spill] sm:$0xff] }
 0x35d   :  { %v1105_v33 = vsel %vm115_vm1, %v1104_v48, %v1101_v22  ;;  %v4130_v48 = vld [vmem:[#allocation33_spill] sm:$0xff]  ;;  %v4135_v22 = vld [vmem:[#allocation38_spill] sm:$0xff] }
 0x35e   :  { %2667 = vtanh.f32 %v1105_v33  ;;  %v4131_v33 = vld [vmem:[#allocation34_spill] sm:$0xff] }
 0x36b   :  { %v2668_v21 = vpop.eup %2667 }
 0x36c   :  { %v1107_v19 = vmul.f32 0.5, %v2668_v21  ;;  %v1111_v17 = vrot.slane %v2668_v21, 6  ;;  %v4134_v21 = vld [vmem:[#allocation37_spill] sm:$0xff] }
 0x36e   :  { %v1108_v20 = vadd.f32 0.5, %v1107_v19  ;;  %v4139_v19 = vld [vmem:[#allocation42_spill] sm:$0xff] }
 0x370   :  { %v1113_v18 = vmul.f32 %v1111_v17, %v1108_v20  ;;  %v1109_v7 = vmul.f32 0.0, %v1108_v20  ;;  %v4128_v17 = vld [vmem:[#allocation31_spill] sm:$0xff] }
 0x372   :  { %v1115_v31 = vrot.slane %v1113_v18, 6  ;;  %v4132_v18 = vld [vmem:[#allocation35_spill] sm:$0xff] }
 0x374   :  { %v3383_v14 = vadd.f32 %v1115_v31, %v1109_v7  ;;  %v4138_v31 = vld [vmem:[#allocation41_spill] sm:$0xff]  ;;  %v4140_v7 = vld [vmem:[#allocation43_spill] sm:$0xff] }
 0x376   :  { %2669 = vtanh.f32 %v3383_v14 }
 0x383   :  { %v2670_v28 = vpop.eup %2669 }
 0x384   :  { %v1120_v30 = vrot.slane %v2670_v28, 6  ;;  %v4141_v28 = vld [vmem:[#allocation44_spill] sm:$0xff] }
 0x386   :  { %v1122_v26 = vmul.f32 %v1120_v30, %v1108_v20  ;;  %v4133_v20 = vld [vmem:[#allocation36_spill] sm:$0xff]  ;;  %v4142_v30 = vld [vmem:[#allocation45_spill] sm:$0xff] }
 0x388   :  { %v1124_v15 = vrot.slane %v1122_v26, 4  ;;  %v4143_v26 = vld [vmem:[#allocation46_spill] sm:$0xff] }
 0x38a   :  { %1191 = vmatmul.mubr.f32.vlgmr.msra.gmra.mxu1 %v1124_v15  ;;  %1262 = vmatmul.mubr.f32.vlgmr.msra.gmra.mxu0 %v1124_v15  ;;  %v4144_v15 = vld [vmem:[#allocation47_spill] sm:$0xff] }
 0x38b   :  { %1317 = vmatpush1.msra.mxu1 %v3118_v34  ;;  %1388 = vmatpush1.msra.mxu0 %v3122_v35 }
 0x38c   :  { %1318 = vmatprep.subr.mxu1 %v3124_v36  ;;  %1389 = vmatprep.subr.mxu0 %v3126_v37 }
 0x38d   :  { %1319 = vmatpush1.msra.mxu1 %v3130_v38  ;;  %1390 = vmatpush1.msra.mxu0 %v3132_v39 }
 0x38e   :  { %1320 = vmatprep.subr.mxu1 %v3134_v40  ;;  %1391 = vmatprep.subr.mxu0 %v3138_v41 }
 0x38f   :  { %1321 = vmatpush1.msra.mxu1 %v3140_v42  ;;  %1392 = vmatpush1.msra.mxu0 %v3142_v43 }
 0x390   :  { %1322 = vmatprep.subr.mxu1 %v3146_v44  ;;  %1393 = vmatprep.subr.mxu0 %v3148_v45 }
 0x391   :  { %1323 = vmatpush1.msra.mxu1 %v3152_v47  ;;  %1394 = vmatpush1.msra.mxu0 %v3154_v49 }
 0x392   :  { %1324 = vmatprep.subr.mxu1 %v3158_v50  ;;  %1395 = vmatprep.subr.mxu0 %v3160_v51 }
 0x393   :  { %1325 = vmatpush1.msra.mxu1 %v3164_v46  ;;  %1396 = vmatpush1.msra.mxu0 %v3166_v52 }
 0x394   :  { %1326 = vmatprep.subr.mxu1 %v3170_v54  ;;  %1397 = vmatprep.subr.mxu0 %v3172_v55 }
 0x395   :  { %1327 = vmatpush1.msra.mxu1 %v3176_v56  ;;  %1398 = vmatpush1.msra.mxu0 %v3178_v57 }
 0x396   :  { %1328 = vmatprep.subr.mxu1 %v3182_v58  ;;  %1399 = vmatprep.subr.mxu0 %v3184_v59 }
 0x397   :  { %1329 = vmatpush1.msra.mxu1 %v3188_v60  ;;  %1400 = vmatpush1.msra.mxu0 %v3190_v61 }
 0x398   :  { %1330 = vmatprep.subr.mxu1 %v3194_v62  ;;  %1401 = vmatprep.subr.mxu0 %v3196_v63 }
 0x399   :  { %1331 = vmatpush1.msra.mxu1 %v3200_v0  ;;  %1402 = vmatpush1.msra.mxu0 %v3202_v53 }
 0x39a   :  { %1332 = vmatprep.subr.mxu1 %v3206_v1  ;;  %1403 = vmatprep.subr.mxu0 %v3208_v2 }
 0x39b   :  { %1333 = vmatpush1.msra.mxu1 %v3212_v3  ;;  %1404 = vmatpush1.msra.mxu0 %v3214_v4 }
 0x39c   :  { %1334 = vmatprep.subr.mxu1 %v3218_v5  ;;  %1405 = vmatprep.subr.mxu0 %v3220_v6 }
 0x39d   :  { %1335 = vmatpush1.msra.mxu1 %v3224_v8  ;;  %1406 = vmatpush1.msra.mxu0 %v3226_v9 }
 0x39e   :  { %1336 = vmatprep.subr.mxu1 %v3230_v10  ;;  %1407 = vmatprep.subr.mxu0 %v3232_v11 }
 0x39f   :  { %1337 = vmatpush1.msra.mxu1 %v3236_v12  ;;  %1408 = vmatpush1.msra.mxu0 %v3238_v13 }
 0x3a0   :  { %1338 = vmatprep.subr.mxu1 %v4127_v25  ;;  %1409 = vmatprep.subr.mxu0 %v3244_v16 }
 0x3a1   :  { %1339 = vmatpush1.msra.mxu1 %v4128_v17  ;;  %1410 = vmatpush1.msra.mxu0 %v4129_v32  ;;  %v4150_v17 = vld [vmem:[#allocation20_spill] sm:$0xff] }
 0x3a2   :  { %1340 = vmatprep.subr.mxu1 %v4130_v48  ;;  %1411 = vmatprep.subr.mxu0 %v4131_v33 }
 0x3a3   :  { %1341 = vmatpush1.msra.mxu1 %v4132_v18  ;;  %1412 = vmatpush1.msra.mxu0 %v4133_v20  ;;  %v4149_v18 = vld [vmem:[#allocation23_spill] sm:$0xff] }
 0x3a4   :  { %1342 = vmatprep.subr.mxu1 %v4134_v21  ;;  %1413 = vmatprep.subr.mxu0 %v4135_v22  ;;  %v4145_v21 = vmov 0.0   ;;  %v4146_v22 = vld [vmem:[#allocation48_spill] sm:$0xff] }
 0x3a5   :  { %1343 = vmatpush1.msra.mxu1 %v4136_v23  ;;  %1414 = vmatpush1.msra.mxu0 %v4137_v27  ;;  %v4147_v27 = vld [vmem:[#allocation27_spill] sm:$0xff] }
 0x3a6   :  { %1344 = vmatprep.subr.mxu1 %v4138_v31  ;;  %1415 = vmatprep.subr.mxu0 %v4139_v19  ;;  %v4148_v31 = vld [vmem:[#allocation28_spill] sm:$0xff] }
 0x3a7   :  { %1345 = vmatpush1.msra.mxu1 %v4140_v7  ;;  %1416 = vmatpush1.msra.mxu0 %v4141_v28 }
 0x3a8   :  { %1346 = vmatprep.subr.mxu1 %v4142_v30  ;;  %1417 = vmatprep.subr.mxu0 %v4143_v26 }
 0x3a9   :  { %1347 = vmatpush1.msra.mxu1 %v4144_v15  ;;  %1380 = vmatprep.mubr.f32.mxu1 %v4145_v21 }
 0x3aa   :  { %1418 = vmatpush1.msra.mxu0 %v4146_v22  ;;  %1451 = vmatprep.mubr.f32.mxu0 %v4145_v21 }
 0x3ab   :  { %1506 = vmatprep.subr.mxu1 %v4147_v27  ;;  %1577 = vmatprep.subr.mxu0 %v4148_v31 }
 0x44a   :  { %v1192_v19 = vpop.f32.mrf.mxu1  ;;  %v1263_v7 = vpop.f32.mrf.mxu0 }
 0x44b   :  { %v1272_v23 = vrot.slane %v1192_v19, 6  ;;  %v1274_v28 = vrot.slane %v1263_v7, 6 }
 0x44c   :  { %v1194_v20 = vpop.f32.mrf.mxu1  ;;  %v1265_v30 = vpop.f32.mrf.mxu0 }
 0x44d   :  { %v1280_v26 = vadd.f32 %v1272_v23, %v4126_v24  ;;  %v1282_v15 = vadd.f32 %v1274_v28, %v4149_v18  ;;  %v1273_v33 = vrot.slane %v1194_v20, 6  ;;  %v1275_v48 = vrot.slane %v1265_v30, 6 }
 0x44f   :  { %v1285_v32 = vrot.slane %v1280_v26, 2  ;;  %v1288_v22 = vrot.slane %v1282_v15, 6  ;;  %v1281_v21 = vadd.f32 %v1273_v33, %v4150_v17  ;;  %v1283_v27 = vadd.f32 %v1275_v48, %v4125_v29 }
 0x451   :  { %v1293_v31 = vsel %vm71_vm0, %v1285_v32, %v1281_v21  ;;  %v1291_v16 = vrot.slane %v1283_v27, 4  ;;  %v4156_v27 = vld [vmem:[#allocation34_spill] sm:$0xff] }
 0x452   :  { %v1294_v19 = vsel %vm161_vm3, %v1293_v31, %v1288_v22  ;;  %v4155_v22 = vld [vmem:[#allocation33_spill] sm:$0xff]  ;;  %v4157_v31 = vld [vmem:[#allocation35_spill] sm:$0xff] }
 0x453   :  { %v1295_v7 = vsel %vm115_vm1, %v1294_v19, %v1291_v16  ;;  %v4151_v16 = vld [vmem:[#allocation29_spill] sm:$0xff]  ;;  %v4158_v19 = vld [vmem:[#allocation36_spill] sm:$0xff] }
 0x454   :  { %2671 = vtanh.f32 %v1295_v7  ;;  %v4159_v7 = vld [vmem:[#allocation37_spill] sm:$0xff] }
 0x461   :  { %v2672_v25 = vpop.eup %2671 }
 0x462   :  { %v1297_v23 = vmul.f32 0.5, %v2672_v25  ;;  %v1301_v24 = vrot.slane %v2672_v25, 6  ;;  %v4154_v25 = vld [vmem:[#allocation32_spill] sm:$0xff] }
 0x464   :  { %v1298_v28 = vadd.f32 0.5, %v1297_v23  ;;  %v4160_v23 = vld [vmem:[#allocation38_spill] sm:$0xff] }
 0x466   :  { %v1303_v20 = vmul.f32 %v1301_v24, %v1298_v28  ;;  %v1299_v30 = vmul.f32 %v1298_v28, %v3383_v14  ;;  %v4152_v24 = vld [vmem:[#allocation30_spill] sm:$0xff]  ;;  %v4153_v14 = vld [vmem:[#allocation31_spill] sm:$0xff] }
 0x468   :  { %v1305_v26 = vrot.slane %v1303_v20, 6  ;;  %v4162_v20 = vld [vmem:[#allocation40_spill] sm:$0xff] }
 0x46a   :  { %v3460_v15 = vadd.f32 %v1305_v26, %v1299_v30  ;;  %v4163_v30 = vld [vmem:[#allocation41_spill] sm:$0xff]  ;;  %v4164_v26 = vld [vmem:[#allocation42_spill] sm:$0xff] }
 0x46c   :  { %2673 = vtanh.f32 %v3460_v15 }
 0x479   :  { %v2674_v48 = vpop.eup %2673 }
 0x47a   :  { %v1310_v32 = vrot.slane %v2674_v48, 6  ;;  %v4165_v48 = vld [vmem:[#allocation43_spill] sm:$0xff] }
 0x47c   :  { %v1312_v33 = vmul.f32 %v1310_v32, %v1298_v28  ;;  %v4161_v28 = vld [vmem:[#allocation39_spill] sm:$0xff]  ;;  %v4166_v32 = vld [vmem:[#allocation44_spill] sm:$0xff] }
 0x47e   :  { %v1314_v21 = vrot.slane %v1312_v33, 4  ;;  %v4167_v33 = vld [vmem:[#allocation45_spill] sm:$0xff] }
 0x480   :  { %1381 = vmatmul.mubr.f32.vlgmr.msra.gmra.mxu1 %v1314_v21  ;;  %1452 = vmatmul.mubr.f32.vlgmr.msra.gmra.mxu0 %v1314_v21  ;;  %v4168_v21 = vld [vmem:[#allocation46_spill] sm:$0xff] }
 0x481   :  { %1507 = vmatpush1.msra.mxu1 %v3118_v34  ;;  %1578 = vmatpush1.msra.mxu0 %v3122_v35 }
 0x482   :  { %1508 = vmatprep.subr.mxu1 %v3124_v36  ;;  %1579 = vmatprep.subr.mxu0 %v3126_v37 }
 0x483   :  { %1509 = vmatpush1.msra.mxu1 %v3130_v38  ;;  %1580 = vmatpush1.msra.mxu0 %v3132_v39 }
 0x484   :  { %1510 = vmatprep.subr.mxu1 %v3134_v40  ;;  %1581 = vmatprep.subr.mxu0 %v3138_v41 }
 0x485   :  { %1511 = vmatpush1.msra.mxu1 %v3140_v42  ;;  %1582 = vmatpush1.msra.mxu0 %v3142_v43 }
 0x486   :  { %1512 = vmatprep.subr.mxu1 %v3146_v44  ;;  %1583 = vmatprep.subr.mxu0 %v3148_v45 }
 0x487   :  { %1513 = vmatpush1.msra.mxu1 %v3152_v47  ;;  %1584 = vmatpush1.msra.mxu0 %v3154_v49 }
 0x488   :  { %1514 = vmatprep.subr.mxu1 %v3158_v50  ;;  %1585 = vmatprep.subr.mxu0 %v3160_v51 }
 0x489   :  { %1515 = vmatpush1.msra.mxu1 %v3164_v46  ;;  %1586 = vmatpush1.msra.mxu0 %v3166_v52 }
 0x48a   :  { %1516 = vmatprep.subr.mxu1 %v3170_v54  ;;  %1587 = vmatprep.subr.mxu0 %v3172_v55 }
 0x48b   :  { %1517 = vmatpush1.msra.mxu1 %v3176_v56  ;;  %1588 = vmatpush1.msra.mxu0 %v3178_v57 }
 0x48c   :  { %1518 = vmatprep.subr.mxu1 %v3182_v58  ;;  %1589 = vmatprep.subr.mxu0 %v3184_v59 }
 0x48d   :  { %1519 = vmatpush1.msra.mxu1 %v3188_v60  ;;  %1590 = vmatpush1.msra.mxu0 %v3190_v61 }
 0x48e   :  { %1520 = vmatprep.subr.mxu1 %v3194_v62  ;;  %1591 = vmatprep.subr.mxu0 %v3196_v63 }
 0x48f   :  { %1521 = vmatpush1.msra.mxu1 %v3200_v0  ;;  %1592 = vmatpush1.msra.mxu0 %v3202_v53 }
 0x490   :  { %1522 = vmatprep.subr.mxu1 %v3206_v1  ;;  %1593 = vmatprep.subr.mxu0 %v3208_v2 }
 0x491   :  { %1523 = vmatpush1.msra.mxu1 %v3212_v3  ;;  %1594 = vmatpush1.msra.mxu0 %v3214_v4 }
 0x492   :  { %1524 = vmatprep.subr.mxu1 %v3218_v5  ;;  %1595 = vmatprep.subr.mxu0 %v3220_v6 }
 0x493   :  { %1525 = vmatpush1.msra.mxu1 %v3224_v8  ;;  %1596 = vmatpush1.msra.mxu0 %v3226_v9 }
 0x494   :  { %1526 = vmatprep.subr.mxu1 %v3230_v10  ;;  %1597 = vmatprep.subr.mxu0 %v3232_v11 }
 0x495   :  { %1527 = vmatpush1.msra.mxu1 %v3236_v12  ;;  %1598 = vmatpush1.msra.mxu0 %v3238_v13 }
 0x496   :  { %1528 = vmatprep.subr.mxu1 %v4151_v16  ;;  %1599 = vmatprep.subr.mxu0 %v4152_v24 }
 0x497   :  { %1529 = vmatpush1.msra.mxu1 %v4153_v14  ;;  %1600 = vmatpush1.msra.mxu0 %v4154_v25 }
 0x498   :  { %1530 = vmatprep.subr.mxu1 %v4155_v22  ;;  %1601 = vmatprep.subr.mxu0 %v4156_v27 }
 0x499   :  { %1531 = vmatpush1.msra.mxu1 %v4157_v31  ;;  %1602 = vmatpush1.msra.mxu0 %v4158_v19  ;;  %v4169_v19 = vld [vmem:[#allocation47_spill] sm:$0xff] }
 0x49a   :  { %1532 = vmatprep.subr.mxu1 %v4159_v7  ;;  %1603 = vmatprep.subr.mxu0 %v4160_v23  ;;  %v4170_v7 = vmov 0.0   ;;  %v4171_v23 = vld [vmem:[#allocation48_spill] sm:$0xff] }
 0x49b   :  { %1533 = vmatpush1.msra.mxu1 %v4161_v28  ;;  %1604 = vmatpush1.msra.mxu0 %v4162_v20  ;;  %v4172_v20 = vld [vmem:[#allocation27_spill] sm:$0xff] }
 0x49c   :  { %1534 = vmatprep.subr.mxu1 %v4163_v30  ;;  %1605 = vmatprep.subr.mxu0 %v4164_v26  ;;  %v4173_v30 = vld [vmem:[#allocation28_spill] sm:$0xff] }
 0x49d   :  { %1535 = vmatpush1.msra.mxu1 %v4165_v48  ;;  %1606 = vmatpush1.msra.mxu0 %v4166_v32 }
 0x49e   :  { %1536 = vmatprep.subr.mxu1 %v4167_v33  ;;  %1607 = vmatprep.subr.mxu0 %v4168_v21  ;;  %v4174_v33 = vld [vmem:[#allocation19_spill] sm:$0xff] }
 0x49f   :  { %1537 = vmatpush1.msra.mxu1 %v4169_v19  ;;  %1570 = vmatprep.mubr.f32.mxu1 %v4170_v7 }
 0x4a0   :  { %1608 = vmatpush1.msra.mxu0 %v4171_v23  ;;  %1641 = vmatprep.mubr.f32.mxu0 %v4170_v7 }
 0x4a1   :  { %1696 = vmatprep.subr.mxu1 %v4172_v20  ;;  %1767 = vmatprep.subr.mxu0 %v4173_v30 }
 0x540   :  { %v1382_v26 = vpop.f32.mrf.mxu1  ;;  %v1453_v48 = vpop.f32.mrf.mxu0 }
 0x541   :  { %v1462_v28 = vrot.slane %v1382_v26, 4  ;;  %v1464_v19 = vrot.slane %v1453_v48, 4 }
 0x542   :  { %v1384_v32 = vpop.f32.mrf.mxu1  ;;  %v1455_v31 = vpop.f32.mrf.mxu0 }
 0x543   :  { %v1470_v27 = vadd.f32 %v1462_v28, %v4174_v33  ;;  %v1463_v21 = vrot.slane %v1384_v32, 4  ;;  %v1465_v22 = vrot.slane %v1455_v31, 4  ;;  %v1472_v20 = vadd.f32 %v1464_v19, %v4149_v18 }
 0x545   :  { %v1471_v25 = vadd.f32 %v1463_v21, %v4150_v17  ;;  %v1473_v23 = vadd.f32 %v1465_v22, %v4125_v29  ;;  %v1475_v14 = vrot.slane %v1470_v27, 4 }
 0x547   :  { %v1478_v7 = vrot.slane %v1471_v25, 2  ;;  %v1481_v24 = vrot.slane %v1473_v23, 6  ;;  %v4196_v23 = vld [vmem:[#allocation27_spill] sm:$0xff] }
 0x549   :  { %v1483_v30 = vsel %vm71_vm0, %v1475_v14, %v1478_v7 }
 0x54a   :  { %v1484_v26 = vsel %vm161_vm3, %v1483_v30, %v1472_v20  ;;  %v4197_v20 = vld [vmem:[#allocation28_spill] sm:$0xff] }
 0x54b   :  { %v1485_v16 = vsel %vm115_vm1, %v1484_v26, %v1481_v24  ;;  %v4195_v24 = vld [vmem:[#allocation48_spill] sm:$0xff] }
 0x54c   :  { %2675 = vtanh.f32 %v1485_v16  ;;  %v4194_v16 = vmov 0.0  }
 0x559   :  { %v2676_v28 = vpop.eup %2675 }
 0x55a   :  { %v1487_v32 = vmul.f32 0.5, %v2676_v28  ;;  %v1491_v31 = vrot.slane %v2676_v28, 6 }
 0x55c   :  { %v1488_v48 = vadd.f32 0.5, %v1487_v32 }
 0x55e   :  { %v1493_v33 = vmul.f32 %v1491_v31, %v1488_v48  ;;  %v1489_v21 = vmul.f32 %v1488_v48, %v3460_v15  ;;  %v4193_v15 = vld [vmem:[#allocation47_spill] sm:$0xff] }
 0x560   :  { %v1495_v22 = vrot.slane %v1493_v33, 6 }
 0x562   :  { %v3537_v27 = vadd.f32 %v1495_v22, %v1489_v21 }
 0x564   :  { %2677 = vtanh.f32 %v3537_v27 }
 0x571   :  { %v2678_v25 = vpop.eup %2677 }
 0x572   :  { %v1500_v14 = vrot.slane %v2678_v25, 6 }
 0x574   :  { %v1502_v19 = vmul.f32 %v1500_v14, %v1488_v48  ;;  %v4198_v48 = vld [vmem:[#allocation19_spill] sm:$0xff] }
 0x576   :  { %v1504_v7 = vrot.slane %v1502_v19, 4 }
 0x578   :  { %1571 = vmatmul.mubr.f32.vlgmr.msra.gmra.mxu1 %v1504_v7  ;;  %1642 = vmatmul.mubr.f32.vlgmr.msra.gmra.mxu0 %v1504_v7 }
 0x579   :  { %1697 = vmatpush1.msra.mxu1 %v3118_v34  ;;  %1768 = vmatpush1.msra.mxu0 %v3122_v35  ;;  %v4175_v34 = vld [vmem:[#allocation29_spill] sm:$0xff]  ;;  %v4176_v35 = vld [vmem:[#allocation30_spill] sm:$0xff] }
 0x57a   :  { %1698 = vmatprep.subr.mxu1 %v3124_v36  ;;  %1769 = vmatprep.subr.mxu0 %v3126_v37  ;;  %v4177_v36 = vld [vmem:[#allocation31_spill] sm:$0xff]  ;;  %v4178_v37 = vld [vmem:[#allocation32_spill] sm:$0xff] }
 0x57b   :  { %1699 = vmatpush1.msra.mxu1 %v3130_v38  ;;  %1770 = vmatpush1.msra.mxu0 %v3132_v39  ;;  %v4179_v38 = vld [vmem:[#allocation33_spill] sm:$0xff]  ;;  %v4180_v39 = vld [vmem:[#allocation34_spill] sm:$0xff] }
 0x57c   :  { %1700 = vmatprep.subr.mxu1 %v3134_v40  ;;  %1771 = vmatprep.subr.mxu0 %v3138_v41  ;;  %v4181_v40 = vld [vmem:[#allocation35_spill] sm:$0xff]  ;;  %v4182_v41 = vld [vmem:[#allocation36_spill] sm:$0xff] }
 0x57d   :  { %1701 = vmatpush1.msra.mxu1 %v3140_v42  ;;  %1772 = vmatpush1.msra.mxu0 %v3142_v43  ;;  %v4183_v42 = vld [vmem:[#allocation37_spill] sm:$0xff]  ;;  %v4184_v43 = vld [vmem:[#allocation38_spill] sm:$0xff] }
 0x57e   :  { %1702 = vmatprep.subr.mxu1 %v3146_v44  ;;  %1773 = vmatprep.subr.mxu0 %v3148_v45  ;;  %v4185_v44 = vld [vmem:[#allocation39_spill] sm:$0xff]  ;;  %v4186_v45 = vld [vmem:[#allocation40_spill] sm:$0xff] }
 0x57f   :  { %1703 = vmatpush1.msra.mxu1 %v3152_v47  ;;  %1774 = vmatpush1.msra.mxu0 %v3154_v49  ;;  %v4187_v47 = vld [vmem:[#allocation41_spill] sm:$0xff]  ;;  %v4188_v49 = vld [vmem:[#allocation42_spill] sm:$0xff] }
 0x580   :  { %1704 = vmatprep.subr.mxu1 %v3158_v50  ;;  %1775 = vmatprep.subr.mxu0 %v3160_v51  ;;  %v4189_v50 = vld [vmem:[#allocation43_spill] sm:$0xff]  ;;  %v4190_v51 = vld [vmem:[#allocation44_spill] sm:$0xff] }
 0x581   :  { %1705 = vmatpush1.msra.mxu1 %v3164_v46  ;;  %1776 = vmatpush1.msra.mxu0 %v3166_v52  ;;  %v4191_v46 = vld [vmem:[#allocation45_spill] sm:$0xff]  ;;  %v4192_v52 = vld [vmem:[#allocation46_spill] sm:$0xff] }
 0x582   :  { %1706 = vmatprep.subr.mxu1 %v3170_v54  ;;  %1777 = vmatprep.subr.mxu0 %v3172_v55 }
 0x583   :  { %1707 = vmatpush1.msra.mxu1 %v3176_v56  ;;  %1778 = vmatpush1.msra.mxu0 %v3178_v57 }
 0x584   :  { %1708 = vmatprep.subr.mxu1 %v3182_v58  ;;  %1779 = vmatprep.subr.mxu0 %v3184_v59 }
 0x585   :  { %1709 = vmatpush1.msra.mxu1 %v3188_v60  ;;  %1780 = vmatpush1.msra.mxu0 %v3190_v61 }
 0x586   :  { %1710 = vmatprep.subr.mxu1 %v3194_v62  ;;  %1781 = vmatprep.subr.mxu0 %v3196_v63 }
 0x587   :  { %1711 = vmatpush1.msra.mxu1 %v3200_v0  ;;  %1782 = vmatpush1.msra.mxu0 %v3202_v53 }
 0x588   :  { %1712 = vmatprep.subr.mxu1 %v3206_v1  ;;  %1783 = vmatprep.subr.mxu0 %v3208_v2 }
 0x589   :  { %1713 = vmatpush1.msra.mxu1 %v3212_v3  ;;  %1784 = vmatpush1.msra.mxu0 %v3214_v4 }
 0x58a   :  { %1714 = vmatprep.subr.mxu1 %v3218_v5  ;;  %1785 = vmatprep.subr.mxu0 %v3220_v6 }
 0x58b   :  { %1715 = vmatpush1.msra.mxu1 %v3224_v8  ;;  %1786 = vmatpush1.msra.mxu0 %v3226_v9 }
 0x58c   :  { %1716 = vmatprep.subr.mxu1 %v3230_v10  ;;  %1787 = vmatprep.subr.mxu0 %v3232_v11 }
 0x58d   :  { %1717 = vmatpush1.msra.mxu1 %v3236_v12  ;;  %1788 = vmatpush1.msra.mxu0 %v3238_v13 }
 0x58e   :  { %1718 = vmatprep.subr.mxu1 %v4175_v34  ;;  %1789 = vmatprep.subr.mxu0 %v4176_v35 }
 0x58f   :  { %1719 = vmatpush1.msra.mxu1 %v4177_v36  ;;  %1790 = vmatpush1.msra.mxu0 %v4178_v37 }
 0x590   :  { %1720 = vmatprep.subr.mxu1 %v4179_v38  ;;  %1791 = vmatprep.subr.mxu0 %v4180_v39 }
 0x591   :  { %1721 = vmatpush1.msra.mxu1 %v4181_v40  ;;  %1792 = vmatpush1.msra.mxu0 %v4182_v41 }
 0x592   :  { %1722 = vmatprep.subr.mxu1 %v4183_v42  ;;  %1793 = vmatprep.subr.mxu0 %v4184_v43 }
 0x593   :  { %1723 = vmatpush1.msra.mxu1 %v4185_v44  ;;  %1794 = vmatpush1.msra.mxu0 %v4186_v45 }
 0x594   :  { %1724 = vmatprep.subr.mxu1 %v4187_v47  ;;  %1795 = vmatprep.subr.mxu0 %v4188_v49 }
 0x595   :  { %1725 = vmatpush1.msra.mxu1 %v4189_v50  ;;  %1796 = vmatpush1.msra.mxu0 %v4190_v51 }
 0x596   :  { %1726 = vmatprep.subr.mxu1 %v4191_v46  ;;  %1797 = vmatprep.subr.mxu0 %v4192_v52 }
 0x597   :  { %1727 = vmatpush1.msra.mxu1 %v4193_v15  ;;  %1760 = vmatprep.mubr.f32.mxu1 %v4194_v16 }
 0x598   :  { %1798 = vmatpush1.msra.mxu0 %v4195_v24  ;;  %1831 = vmatprep.mubr.f32.mxu0 %v4194_v16 }
 0x599   :  { %1874 = vmatprep.subr.mxu1 %v4196_v23  ;;  %1945 = vmatprep.subr.mxu0 %v4197_v20 }
 0x638   :  { %v1572_v30 = vpop.f32.mrf.mxu1  ;;  %v1643_v33 = vpop.f32.mrf.mxu0 }
 0x639   :  { %v1652_v26 = vrot.slane %v1572_v30, 2  ;;  %v1654_v28 = vrot.slane %v1643_v33, 2 }
 0x63a   :  { %v1574_v32 = vpop.f32.mrf.mxu1  ;;  %v1645_v31 = vpop.f32.mrf.mxu0 }
 0x63b   :  { %v1660_v21 = vadd.f32 %v1652_v26, %v4198_v48  ;;  %v1653_v22 = vrot.slane %v1574_v32, 2  ;;  %v1662_v25 = vadd.f32 %v1654_v28, %v4149_v18  ;;  %v1655_v19 = vrot.slane %v1645_v31, 2 }
 0x63d   :  { %v1661_v14 = vadd.f32 %v1653_v22, %v4150_v17  ;;  %v1665_v7 = vrot.slane %v1660_v21, 6  ;;  %v1671_v16 = vrot.slane %v1662_v25, 2  ;;  %v1663_v20 = vadd.f32 %v1655_v19, %v4125_v29  ;;  %v3626_v25 = vld [vmem:[#allocation2 + $0x1d8] sm:$0xff]  ;;  %v3632_v19 = vld [vmem:[#allocation2 + $0x1d0] sm:$0xff] }
 0x63f   :  { %v1668_v24 = vrot.slane %v1661_v14, 4  ;;  %v3629_v14 = vld [vmem:[#allocation2 + $0x1c0] sm:$0xff] }
 0x641   :  { %v1673_v23 = vsel %vm71_vm0, %v1665_v7, %v1668_v24  ;;  %v3635_v7 = vld [vmem:[#allocation2 + $0x1a8] sm:$0xff] }
 0x642   :  { %v1674_v30 = vsel %vm161_vm3, %v1673_v23, %v1671_v16  ;;  %v3617_v16 = vld [vmem:[#allocation2 + $0x1e0] sm:$0xff]  ;;  %v3638_v23 = vld [vmem:[#allocation2 + $0x1b8] sm:$0xff] }
 0x643   :  { %v1675_v33 = vsel %vm115_vm1, %v1674_v30, %v1663_v20  ;;  %v3641_v20 = vld [vmem:[#allocation2 + $0x1a0] sm:$0xff]  ;;  %v3644_v30 = vld [vmem:[#allocation2 + $0x1b0] sm:$0xff] }
 0x644   :  { %2679 = vtanh.f32 %v1675_v33  ;;  %v3647_v33 = vld [vmem:[#allocation2 + $0x188] sm:$0xff] }
 0x651   :  { %v2680_v15 = vpop.eup %2679 }
 0x652   :  { %v1677_v26 = vmul.f32 0.5, %v2680_v15  ;;  %v1681_v32 = vrot.slane %v2680_v15, 6  ;;  %v3620_v15 = vld [vmem:[#allocation2 + $0x1f0] sm:$0xff] }
 0x654   :  { %v1678_v48 = vadd.f32 0.5, %v1677_v26  ;;  %v3650_v26 = vld [vmem:[#allocation2 + $0x198] sm:$0xff] }
 0x656   :  { %v1683_v18 = vmul.f32 %v1681_v32, %v1678_v48  ;;  %v1679_v17 = vmul.f32 %v1678_v48, %v3537_v27  ;;  %v3623_v27 = vld [vmem:[#allocation2 + $0x1c8] sm:$0xff]  ;;  %v3653_v32 = vld [vmem:[#allocation2 + $0x180] sm:$0xff] }
 0x658   :  { %v1685_v28 = vrot.slane %v1683_v18, 6  ;;  %v3659_v18 = vld [vmem:[#allocation2 + $0x168] sm:$0xff] }
 0x65a   :  { %v3614_v31 = vadd.f32 %v1685_v28, %v1679_v17  ;;  %v3662_v17 = vld [vmem:[#allocation2 + $0x178] sm:$0xff]  ;;  %v3665_v28 = vld [vmem:[#allocation2 + $0x160] sm:$0xff] }
 0x65c   :  { %2681 = vtanh.f32 %v3614_v31 }
 0x669   :  { %v2682_v24 = vpop.eup %2681 }
 0x66a   :  { %v1690_v21 = vrot.slane %v2682_v24, 6  ;;  %v3668_v24 = vld [vmem:[#allocation2 + $0x170] sm:$0xff] }
 0x66c   :  { %v1692_v29 = vmul.f32 %v1690_v21, %v1678_v48  ;;  %v3656_v48 = vld [vmem:[#allocation2 + $0x190] sm:$0xff]  ;;  %v3776_v21 = vld [vmem:[#allocation2 + $0x108] sm:$0xff] }
 0x66e   :  { %v1694_v22 = vrot.slane %v1692_v29, 4  ;;  %v3779_v29 = vld [vmem:[#allocation2 + $0x118] sm:$0xff] }
 0x670   :  { %1761 = vmatmul.mubr.f32.vlgmr.msra.gmra.mxu1 %v1694_v22  ;;  %1832 = vmatmul.mubr.f32.vlgmr.msra.gmra.mxu0 %v1694_v22  ;;  %v3782_v22 = vld [vmem:[#allocation2 + $0x100] sm:$0xff] }
 0x671   :  { %1875 = vmatpush1.msra.mxu1 %v3617_v16  ;;  %1946 = vmatpush1.msra.mxu0 %v3620_v15 }
 0x672   :  { %1876 = vmatprep.subr.mxu1 %v3623_v27  ;;  %1947 = vmatprep.subr.mxu0 %v3626_v25 }
 0x673   :  { %1877 = vmatpush1.msra.mxu1 %v3629_v14  ;;  %1948 = vmatpush1.msra.mxu0 %v3632_v19 }
 0x674   :  { %1878 = vmatprep.subr.mxu1 %v3635_v7  ;;  %1949 = vmatprep.subr.mxu0 %v3638_v23 }
 0x675   :  { %1879 = vmatpush1.msra.mxu1 %v3641_v20  ;;  %1950 = vmatpush1.msra.mxu0 %v3644_v30 }
 0x676   :  { %1880 = vmatprep.subr.mxu1 %v3647_v33  ;;  %1951 = vmatprep.subr.mxu0 %v3650_v26 }
 0x677   :  { %1881 = vmatpush1.msra.mxu1 %v3653_v32  ;;  %1952 = vmatpush1.msra.mxu0 %v3656_v48 }
 0x678   :  { %1882 = vmatprep.subr.mxu1 %v3659_v18  ;;  %1953 = vmatprep.subr.mxu0 %v3662_v17 }
 0x679   :  { %1883 = vmatpush1.msra.mxu1 %v3665_v28  ;;  %1954 = vmatpush1.msra.mxu0 %v3668_v24 }
 0x67a   :  { %1884 = vmatprep.subr.mxu1 %v3170_v54  ;;  %1955 = vmatprep.subr.mxu0 %v3172_v55  ;;  %v4199_v54 = vld [vmem:[#allocation47_spill] sm:$0xff]  ;;  %v4200_v55 = vmov 0.0  }
 0x67b   :  { %1885 = vmatpush1.msra.mxu1 %v3176_v56  ;;  %1956 = vmatpush1.msra.mxu0 %v3178_v57  ;;  %v4201_v56 = vld [vmem:[#allocation48_spill] sm:$0xff] }
 0x67c   :  { %1886 = vmatprep.subr.mxu1 %v3182_v58  ;;  %1957 = vmatprep.subr.mxu0 %v3184_v59  ;;  %v3717_v57 = vld [vmem:[#allocation2 + $0x1e8] sm:$0xff]  ;;  %v3720_v58 = vld [vmem:[#allocation2 + $0x1f8] sm:$0xff] }
 0x67d   :  { %1887 = vmatpush1.msra.mxu1 %v3188_v60  ;;  %1958 = vmatpush1.msra.mxu0 %v3190_v61  ;;  %v4202_v61 = vld [vmem:[#allocation25_spill] sm:$0xff] }
 0x67e   :  { %1888 = vmatprep.subr.mxu1 %v3194_v62  ;;  %1959 = vmatprep.subr.mxu0 %v3196_v63 }
 0x67f   :  { %1889 = vmatpush1.msra.mxu1 %v3200_v0  ;;  %1960 = vmatpush1.msra.mxu0 %v3202_v53  ;;  %v4203_v53 = vld [vmem:[#allocation22_spill] sm:$0xff] }
 0x680   :  { %1890 = vmatprep.subr.mxu1 %v3206_v1  ;;  %1961 = vmatprep.subr.mxu0 %v3208_v2  ;;  %v4204_v2 = vld [vmem:[#allocation26_spill] sm:$0xff] }
 0x681   :  { %1891 = vmatpush1.msra.mxu1 %v3212_v3  ;;  %1962 = vmatpush1.msra.mxu0 %v3214_v4  ;;  %v4205_v4 = vld [vmem:[#allocation21_spill] sm:$0xff] }
 0x682   :  { %1892 = vmatprep.subr.mxu1 %v3218_v5  ;;  %1963 = vmatprep.subr.mxu0 %v3220_v6 }
 0x683   :  { %1893 = vmatpush1.msra.mxu1 %v3224_v8  ;;  %1964 = vmatpush1.msra.mxu0 %v3226_v9 }
 0x684   :  { %1894 = vmatprep.subr.mxu1 %v3230_v10  ;;  %1965 = vmatprep.subr.mxu0 %v3232_v11 }
 0x685   :  { %1895 = vmatpush1.msra.mxu1 %v3236_v12  ;;  %1966 = vmatpush1.msra.mxu0 %v3238_v13 }
 0x686   :  { %1896 = vmatprep.subr.mxu1 %v4175_v34  ;;  %1967 = vmatprep.subr.mxu0 %v4176_v35 }
 0x687   :  { %1897 = vmatpush1.msra.mxu1 %v4177_v36  ;;  %1968 = vmatpush1.msra.mxu0 %v4178_v37 }
 0x688   :  { %1898 = vmatprep.subr.mxu1 %v4179_v38  ;;  %1969 = vmatprep.subr.mxu0 %v4180_v39 }
 0x689   :  { %1899 = vmatpush1.msra.mxu1 %v4181_v40  ;;  %1970 = vmatpush1.msra.mxu0 %v4182_v41 }
 0x68a   :  { %1900 = vmatprep.subr.mxu1 %v4183_v42  ;;  %1971 = vmatprep.subr.mxu0 %v4184_v43 }
 0x68b   :  { %1901 = vmatpush1.msra.mxu1 %v4185_v44  ;;  %1972 = vmatpush1.msra.mxu0 %v4186_v45  ;;  %v3752_v45 = vld [vmem:[#allocation2 + $0x148] sm:$0xff] }
 0x68c   :  { %1902 = vmatprep.subr.mxu1 %v4187_v47  ;;  %1973 = vmatprep.subr.mxu0 %v4188_v49  ;;  %v3755_v47 = vld [vmem:[#allocation2 + $0x158] sm:$0xff]  ;;  %v3758_v49 = vld [vmem:[#allocation2 + $0x140] sm:$0xff] }
 0x68d   :  { %1903 = vmatpush1.msra.mxu1 %v4189_v50  ;;  %1974 = vmatpush1.msra.mxu0 %v4190_v51  ;;  %v3761_v50 = vld [vmem:[#allocation2 + $0x150] sm:$0xff]  ;;  %v3764_v51 = vld [vmem:[#allocation2 + $0x128] sm:$0xff] }
 0x68e   :  { %1904 = vmatprep.subr.mxu1 %v4191_v46  ;;  %1975 = vmatprep.subr.mxu0 %v4192_v52  ;;  %v3767_v46 = vld [vmem:[#allocation2 + $0x138] sm:$0xff]  ;;  %v3770_v52 = vld [vmem:[#allocation2 + $0x120] sm:$0xff] }
 0x68f   :  { %1905 = vmatpush1.msra.mxu1 %v4199_v54  ;;  %1938 = vmatprep.mubr.f32.mxu1 %v4200_v55  ;;  %v3785_v54 = vld [vmem:[#allocation2 + $0x110] sm:$0xff] }
 0x690   :  { %1976 = vmatpush1.msra.mxu0 %v4201_v56  ;;  %2009 = vmatprep.mubr.f32.mxu0 %v4200_v55  ;;  %v3788_v56 = vld [vmem:[#allocation2 + $0xe8] sm:$0xff] }
 0x691   :  { %2064 = vmatprep.subr.mxu1 %v3717_v57  ;;  %2135 = vmatprep.subr.mxu0 %v3720_v58 }
 0x730   :  { %v1762_v59 = vpop.f32.mrf.mxu1  ;;  %v1833_v60 = vpop.f32.mrf.mxu0 }
 0x731   :  { %v1840_v62 = vadd.f32 %v1833_v60, %v4202_v61  ;;  %v1838_v5 = vadd.f32 %v1762_v59, %v4205_v4  ;;  %v3791_v59 = vld [vmem:[#allocation2 + $0xf8] sm:$0xff]  ;;  %v3794_v60 = vld [vmem:[#allocation2 + $0xe0] sm:$0xff] }
 0x732   :  { %v1764_v63 = vpop.f32.mrf.mxu1  ;;  %v1835_v0 = vpop.f32.mrf.mxu0 }
 0x733   :  { %v1839_v1 = vadd.f32 %v1764_v63, %v4203_v53  ;;  %v1841_v3 = vadd.f32 %v1835_v0, %v4204_v2  ;;  %v1846_v8 = vrot.slane %v1840_v62, 4  ;;  %v3797_v62 = vld [vmem:[#allocation2 + $0xf0] sm:$0xff]  ;;  %v3800_v63 = vld [vmem:[#allocation2 + $0xc8] sm:$0xff]  ;;  %v3803_v0 = vld [vmem:[#allocation2 + $0xd8] sm:$0xff] }
 0x735   :  { %v1843_v6 = vrot.slane %v1839_v1, 6  ;;  %v1849_v10 = vrot.slane %v1841_v3, 2  ;;  %v3806_v1 = vld [vmem:[#allocation2 + $0xc0] sm:$0xff]  ;;  %v3809_v3 = vld [vmem:[#allocation2 + $0xd0] sm:$0xff] }
 0x737   :  { %v1851_v9 = vsel %vm71_vm0, %v1838_v5, %v1843_v6  ;;  %v3812_v5 = vld [vmem:[#allocation2 + $0xa8] sm:$0xff]  ;;  %v3815_v6 = vld [vmem:[#allocation2 + $0xb8] sm:$0xff] }
 0x738   :  { %v1852_v11 = vsel %vm161_vm3, %v1851_v9, %v1846_v8  ;;  %v3818_v8 = vld [vmem:[#allocation2 + $0xa0] sm:$0xff]  ;;  %v3821_v9 = vld [vmem:[#allocation2 + $0xb0] sm:$0xff] }
 0x739   :  { %v1853_v12 = vsel %vm115_vm1, %v1852_v11, %v1849_v10  ;;  %v3824_v10 = vld [vmem:[#allocation2 + $0x88] sm:$0xff]  ;;  %v3827_v11 = vld [vmem:[#allocation2 + $0x98] sm:$0xff] }
 0x73a   :  { %2683 = vtanh.f32 %v1853_v12  ;;  %4206 = vst [vmem:[#allocation24_spill] sm:$0xff] %v3824_v10  ;;  %4207 = vst [vmem:[#allocation23_spill] sm:$0xff] %v3827_v11  ;;  %v3830_v12 = vld [vmem:[#allocation2 + $0x80] sm:$0xff] }
 0x73b   :  { %4208 = vst [vmem:[#allocation20_spill] sm:$0xff] %v3830_v12 }
 0x747   :  { %v2684_v13 = vpop.eup %2683 }
 0x748   :  { %v1855_v34 = vmul.f32 0.5, %v2684_v13  ;;  %v1859_v35 = vrot.slane %v2684_v13, 6  ;;  %v3833_v13 = vld [vmem:[#allocation2 + $0x90] sm:$0xff] }
 0x749   :  { %4209 = vst [vmem:[#allocation29_spill] sm:$0xff] %v3833_v13 }
 0x74a   :  { %v1856_v36 = vadd.f32 0.5, %v1855_v34  ;;  %v3836_v34 = vld [vmem:[#allocation2 + $0x68] sm:$0xff] }
 0x74b   :  { %4210 = vst [vmem:[#allocation30_spill] sm:$0xff] %v3836_v34 }
 0x74c   :  { %v1861_v37 = vmul.f32 %v1859_v35, %v1856_v36  ;;  %v1857_v38 = vmul.f32 %v1856_v36, %v3614_v31  ;;  %v3773_v31 = vld [vmem:[#allocation2 + $0x130] sm:$0xff]  ;;  %v3839_v35 = vld [vmem:[#allocation2 + $0x78] sm:$0xff] }
 0x74d   :  { %4211 = vst [vmem:[#allocation31_spill] sm:$0xff] %v3839_v35 }
 0x74e   :  { %v1863_v39 = vrot.slane %v1861_v37, 6  ;;  %v3845_v37 = vld [vmem:[#allocation2 + $0x70] sm:$0xff] }
 0x74f   :  { %4213 = vst [vmem:[#allocation33_spill] sm:$0xff] %v3845_v37 }
 0x750   :  { %v3731_v40 = vadd.f32 %v1863_v39, %v1857_v38  ;;  %v3848_v38 = vld [vmem:[#allocation2 + $0x48] sm:$0xff]  ;;  %v3851_v39 = vld [vmem:[#allocation2 + $0x58] sm:$0xff] }
 0x751   :  { %4214 = vst [vmem:[#allocation34_spill] sm:$0xff] %v3848_v38  ;;  %4215 = vst [vmem:[#allocation35_spill] sm:$0xff] %v3851_v39 }
 0x752   :  { %2685 = vtanh.f32 %v3731_v40 }
 0x75f   :  { %v2686_v41 = vpop.eup %2685 }
 0x760   :  { %v1868_v42 = vrot.slane %v2686_v41, 6  ;;  %v3854_v41 = vld [vmem:[#allocation2 + $0x40] sm:$0xff] }
 0x761   :  { %4216 = vst [vmem:[#allocation36_spill] sm:$0xff] %v3854_v41 }
 0x762   :  { %v1870_v43 = vmul.f32 %v1868_v42, %v1856_v36  ;;  %v3842_v36 = vld [vmem:[#allocation2 + $0x60] sm:$0xff]  ;;  %v3857_v42 = vld [vmem:[#allocation2 + $0x50] sm:$0xff] }
 0x763   :  { %4212 = vst [vmem:[#allocation32_spill] sm:$0xff] %v3842_v36  ;;  %4217 = vst [vmem:[#allocation37_spill] sm:$0xff] %v3857_v42 }
 0x764   :  { %v1872_v44 = vrot.slane %v1870_v43, 4  ;;  %v3860_v43 = vld [vmem:[#allocation2 + $0x28] sm:$0xff] }
 0x765   :  { %4218 = vst [vmem:[#allocation38_spill] sm:$0xff] %v3860_v43 }
 0x766   :  { %1939 = vmatmul.mubr.f32.vlgmr.msra.gmra.mxu1 %v1872_v44  ;;  %2010 = vmatmul.mubr.f32.vlgmr.msra.gmra.mxu0 %v1872_v44  ;;  %v3863_v44 = vld [vmem:[#allocation2 + $0x38] sm:$0xff] }
 0x767   :  { %2065 = vmatpush1.msra.mxu1 %v3617_v16  ;;  %2136 = vmatpush1.msra.mxu0 %v3620_v15  ;;  %4219 = vst [vmem:[#allocation39_spill] sm:$0xff] %v3863_v44 }
 0x768   :  { %2066 = vmatprep.subr.mxu1 %v3623_v27  ;;  %2137 = vmatprep.subr.mxu0 %v3626_v25 }
 0x769   :  { %2067 = vmatpush1.msra.mxu1 %v3629_v14  ;;  %2138 = vmatpush1.msra.mxu0 %v3632_v19 }
 0x76a   :  { %2068 = vmatprep.subr.mxu1 %v3635_v7  ;;  %2139 = vmatprep.subr.mxu0 %v3638_v23 }
 0x76b   :  { %2069 = vmatpush1.msra.mxu1 %v3641_v20  ;;  %2140 = vmatpush1.msra.mxu0 %v3644_v30 }
 0x76c   :  { %2070 = vmatprep.subr.mxu1 %v3647_v33  ;;  %2141 = vmatprep.subr.mxu0 %v3650_v26 }
 0x76d   :  { %2071 = vmatpush1.msra.mxu1 %v3653_v32  ;;  %2142 = vmatpush1.msra.mxu0 %v3656_v48 }
 0x76e   :  { %2072 = vmatprep.subr.mxu1 %v3659_v18  ;;  %2143 = vmatprep.subr.mxu0 %v3662_v17 }
 0x76f   :  { %2073 = vmatpush1.msra.mxu1 %v3665_v28  ;;  %2144 = vmatpush1.msra.mxu0 %v3668_v24 }
 0x770   :  { %2074 = vmatprep.subr.mxu1 %v3752_v45  ;;  %2145 = vmatprep.subr.mxu0 %v3755_v47 }
 0x771   :  { %2075 = vmatpush1.msra.mxu1 %v3758_v49  ;;  %2146 = vmatpush1.msra.mxu0 %v3761_v50 }
 0x772   :  { %2076 = vmatprep.subr.mxu1 %v3764_v51  ;;  %2147 = vmatprep.subr.mxu0 %v3767_v46 }
 0x773   :  { %2077 = vmatpush1.msra.mxu1 %v3770_v52  ;;  %2148 = vmatpush1.msra.mxu0 %v3773_v31 }
 0x774   :  { %2078 = vmatprep.subr.mxu1 %v3776_v21  ;;  %2149 = vmatprep.subr.mxu0 %v3779_v29 }
 0x775   :  { %2079 = vmatpush1.msra.mxu1 %v3782_v22  ;;  %2150 = vmatpush1.msra.mxu0 %v3785_v54 }
 0x776   :  { %2080 = vmatprep.subr.mxu1 %v3788_v56  ;;  %2151 = vmatprep.subr.mxu0 %v3791_v59 }
 0x777   :  { %2081 = vmatpush1.msra.mxu1 %v3794_v60  ;;  %2152 = vmatpush1.msra.mxu0 %v3797_v62 }
 0x778   :  { %2082 = vmatprep.subr.mxu1 %v3800_v63  ;;  %2153 = vmatprep.subr.mxu0 %v3803_v0 }
 0x779   :  { %2083 = vmatpush1.msra.mxu1 %v3806_v1  ;;  %2154 = vmatpush1.msra.mxu0 %v3809_v3 }
 0x77a   :  { %2084 = vmatprep.subr.mxu1 %v3812_v5  ;;  %2155 = vmatprep.subr.mxu0 %v3815_v6 }
 0x77b   :  { %2085 = vmatpush1.msra.mxu1 %v3818_v8  ;;  %2156 = vmatpush1.msra.mxu0 %v3821_v9 }
 0x77c   :  { %2086 = vmatprep.subr.mxu1 %v3824_v10  ;;  %2157 = vmatprep.subr.mxu0 %v3827_v11 }
 0x77d   :  { %2087 = vmatpush1.msra.mxu1 %v3830_v12  ;;  %2158 = vmatpush1.msra.mxu0 %v3833_v13 }
 0x77e   :  { %2088 = vmatprep.subr.mxu1 %v3836_v34  ;;  %2159 = vmatprep.subr.mxu0 %v3839_v35 }
 0x77f   :  { %2089 = vmatpush1.msra.mxu1 %v3842_v36  ;;  %2160 = vmatpush1.msra.mxu0 %v3845_v37 }
 0x780   :  { %2090 = vmatprep.subr.mxu1 %v3848_v38  ;;  %2161 = vmatprep.subr.mxu0 %v3851_v39  ;;  %v3866_v38 = vld [vmem:[#allocation2 + $0x20] sm:$0xff]  ;;  %v3869_v39 = vld [vmem:[#allocation2 + $0x30] sm:$0xff] }
 0x781   :  { %2091 = vmatpush1.msra.mxu1 %v3854_v41  ;;  %2162 = vmatpush1.msra.mxu0 %v3857_v42  ;;  %4220 = vst [vmem:[#allocation40_spill] sm:$0xff] %v3866_v38  ;;  %4221 = vst [vmem:[#allocation41_spill] sm:$0xff] %v3869_v39  ;;  %v3872_v41 = vld [vmem:[#allocation2 + $0x8] sm:$0xff]  ;;  %v3875_v42 = vld [vmem:[#allocation2 + $0x18] sm:$0xff] }
 0x782   :  { %2092 = vmatprep.subr.mxu1 %v3860_v43  ;;  %2163 = vmatprep.subr.mxu0 %v3863_v44  ;;  %4222 = vst [vmem:[#allocation42_spill] sm:$0xff] %v3872_v41  ;;  %4223 = vst [vmem:[#allocation43_spill] sm:$0xff] %v3875_v42  ;;  %v3878_v43 = vld [vmem:[#allocation2] sm:$0xff]  ;;  %v3882_v44 = vld [vmem:[#allocation2 + $0x10] sm:$0xff] }
 0x783   :  { %2093 = vmatpush1.msra.mxu1 %v3866_v38  ;;  %2164 = vmatpush1.msra.mxu0 %v3869_v39  ;;  %4224 = vst [vmem:[#allocation44_spill] sm:$0xff] %v3878_v43  ;;  %4225 = vst [vmem:[#allocation45_spill] sm:$0xff] %v3882_v44 }
 0x784   :  { %2094 = vmatprep.subr.mxu1 %v3872_v41  ;;  %2165 = vmatprep.subr.mxu0 %v3875_v42 }
 0x785   :  { %2095 = vmatpush1.msra.mxu1 %v3878_v43  ;;  %2128 = vmatprep.mubr.f32.mxu1 %v4200_v55 }
 0x786   :  { %2166 = vmatpush1.msra.mxu0 %v3882_v44  ;;  %2199 = vmatprep.mubr.f32.mxu0 %v4200_v55 }
 0x787   :  { %2254 = vmatprep.subr.mxu1 %v3717_v57  ;;  %2325 = vmatprep.subr.mxu0 %v3720_v58 }
 0x826   :  { %v1940_v41 = vpop.f32.mrf.mxu1  ;;  %v2011_v39 = vpop.f32.mrf.mxu0 }
 0x827   :  { %v2020_v38 = vrot.slane %v1940_v41, 6  ;;  %v2022_v42 = vrot.slane %v2011_v39, 6 }
 0x828   :  { %v1942_v37 = vpop.f32.mrf.mxu1  ;;  %v2013_v36 = vpop.f32.mrf.mxu0 }
 0x829   :  { %v2028_v43 = vadd.f32 %v2020_v38, %v4205_v4  ;;  %v2030_v35 = vadd.f32 %v2022_v42, %v4202_v61  ;;  %v2021_v34 = vrot.slane %v1942_v37, 6  ;;  %v2023_v13 = vrot.slane %v2013_v36, 6 }
 0x82b   :  { %v2033_v12 = vrot.slane %v2028_v43, 2  ;;  %v2036_v44 = vrot.slane %v2030_v35, 6  ;;  %v2029_v55 = vadd.f32 %v2021_v34, %v4203_v53  ;;  %v2031_v57 = vadd.f32 %v2023_v13, %v4204_v2 }
 0x82d   :  { %v2041_v58 = vsel %vm71_vm0, %v2033_v12, %v2029_v55  ;;  %v2039_v11 = vrot.slane %v2031_v57, 4 }
 0x82e   :  { %v2042_v41 = vsel %vm161_vm3, %v2041_v58, %v2036_v44 }
 0x82f   :  { %v2043_v39 = vsel %vm115_vm1, %v2042_v41, %v2039_v11 }
 0x830   :  { %2687 = vtanh.f32 %v2043_v39 }
 0x83d   :  { %v2688_v10 = vpop.eup %2687 }
 0x83e   :  { %v2045_v38 = vmul.f32 0.5, %v2688_v10  ;;  %v2049_v4 = vrot.slane %v2688_v10, 6 }
 0x840   :  { %v2046_v42 = vadd.f32 0.5, %v2045_v38 }
 0x842   :  { %v2051_v37 = vmul.f32 %v2049_v4, %v2046_v42  ;;  %v2047_v36 = vmul.f32 %v2046_v42, %v3731_v40  ;;  %v4244_v4 = vld [vmem:[#allocation44_spill] sm:$0xff]  ;;  %v4245_v40 = vmov 0.0  }
 0x844   :  { %v2053_v35 = vrot.slane %v2051_v37, 6 }
 0x846   :  { %v3896_v43 = vadd.f32 %v2053_v35, %v2047_v36 }
 0x848   :  { %2689 = vtanh.f32 %v3896_v43 }
 0x855   :  { %v2690_v13 = vpop.eup %2689 }
 0x856   :  { %v2058_v55 = vrot.slane %v2690_v13, 6 }
 0x858   :  { %v2060_v12 = vmul.f32 %v2058_v55, %v2046_v42 }
 0x85a   :  { %v2062_v34 = vrot.slane %v2060_v12, 4 }
 0x85c   :  { %2129 = vmatmul.mubr.f32.vlgmr.msra.gmra.mxu1 %v2062_v34  ;;  %2200 = vmatmul.mubr.f32.vlgmr.msra.gmra.mxu0 %v2062_v34 }
 0x85d   :  { %2255 = vmatpush1.msra.mxu1 %v3617_v16  ;;  %2326 = vmatpush1.msra.mxu0 %v3620_v15  ;;  %v4226_v16 = vld [vmem:[#allocation24_spill] sm:$0xff]  ;;  %v4227_v15 = vld [vmem:[#allocation23_spill] sm:$0xff] }
 0x85e   :  { %2256 = vmatprep.subr.mxu1 %v3623_v27  ;;  %2327 = vmatprep.subr.mxu0 %v3626_v25  ;;  %v4228_v27 = vld [vmem:[#allocation20_spill] sm:$0xff]  ;;  %v4229_v25 = vld [vmem:[#allocation29_spill] sm:$0xff] }
 0x85f   :  { %2257 = vmatpush1.msra.mxu1 %v3629_v14  ;;  %2328 = vmatpush1.msra.mxu0 %v3632_v19  ;;  %v4230_v14 = vld [vmem:[#allocation30_spill] sm:$0xff]  ;;  %v4231_v19 = vld [vmem:[#allocation31_spill] sm:$0xff] }
 0x860   :  { %2258 = vmatprep.subr.mxu1 %v3635_v7  ;;  %2329 = vmatprep.subr.mxu0 %v3638_v23  ;;  %v4232_v7 = vld [vmem:[#allocation32_spill] sm:$0xff]  ;;  %v4233_v23 = vld [vmem:[#allocation33_spill] sm:$0xff] }
 0x861   :  { %2259 = vmatpush1.msra.mxu1 %v3641_v20  ;;  %2330 = vmatpush1.msra.mxu0 %v3644_v30  ;;  %v4234_v20 = vld [vmem:[#allocation34_spill] sm:$0xff]  ;;  %v4235_v30 = vld [vmem:[#allocation35_spill] sm:$0xff] }
 0x862   :  { %2260 = vmatprep.subr.mxu1 %v3647_v33  ;;  %2331 = vmatprep.subr.mxu0 %v3650_v26  ;;  %v4236_v33 = vld [vmem:[#allocation36_spill] sm:$0xff]  ;;  %v4237_v26 = vld [vmem:[#allocation37_spill] sm:$0xff] }
 0x863   :  { %2261 = vmatpush1.msra.mxu1 %v3653_v32  ;;  %2332 = vmatpush1.msra.mxu0 %v3656_v48  ;;  %v4238_v32 = vld [vmem:[#allocation38_spill] sm:$0xff]  ;;  %v4239_v48 = vld [vmem:[#allocation39_spill] sm:$0xff] }
 0x864   :  { %2262 = vmatprep.subr.mxu1 %v3659_v18  ;;  %2333 = vmatprep.subr.mxu0 %v3662_v17  ;;  %v4240_v18 = vld [vmem:[#allocation40_spill] sm:$0xff]  ;;  %v4241_v17 = vld [vmem:[#allocation41_spill] sm:$0xff] }
 0x865   :  { %2263 = vmatpush1.msra.mxu1 %v3665_v28  ;;  %2334 = vmatpush1.msra.mxu0 %v3668_v24  ;;  %v4242_v28 = vld [vmem:[#allocation42_spill] sm:$0xff]  ;;  %v4243_v24 = vld [vmem:[#allocation43_spill] sm:$0xff] }
 0x866   :  { %2264 = vmatprep.subr.mxu1 %v3752_v45  ;;  %2335 = vmatprep.subr.mxu0 %v3755_v47  ;;  %v4246_v45 = vld [vmem:[#allocation45_spill] sm:$0xff] }
 0x867   :  { %2265 = vmatpush1.msra.mxu1 %v3758_v49  ;;  %2336 = vmatpush1.msra.mxu0 %v3761_v50 }
 0x868   :  { %2266 = vmatprep.subr.mxu1 %v3764_v51  ;;  %2337 = vmatprep.subr.mxu0 %v3767_v46 }
 0x869   :  { %2267 = vmatpush1.msra.mxu1 %v3770_v52  ;;  %2338 = vmatpush1.msra.mxu0 %v3773_v31  ;;  %v4247_v52 = vld [vmem:[#allocation21_spill] sm:$0xff] }
 0x86a   :  { %2268 = vmatprep.subr.mxu1 %v3776_v21  ;;  %2339 = vmatprep.subr.mxu0 %v3779_v29 }
 0x86b   :  { %2269 = vmatpush1.msra.mxu1 %v3782_v22  ;;  %2340 = vmatpush1.msra.mxu0 %v3785_v54 }
 0x86c   :  { %2270 = vmatprep.subr.mxu1 %v3788_v56  ;;  %2341 = vmatprep.subr.mxu0 %v3791_v59 }
 0x86d   :  { %2271 = vmatpush1.msra.mxu1 %v3794_v60  ;;  %2342 = vmatpush1.msra.mxu0 %v3797_v62 }
 0x86e   :  { %2272 = vmatprep.subr.mxu1 %v3800_v63  ;;  %2343 = vmatprep.subr.mxu0 %v3803_v0 }
 0x86f   :  { %2273 = vmatpush1.msra.mxu1 %v3806_v1  ;;  %2344 = vmatpush1.msra.mxu0 %v3809_v3 }
 0x870   :  { %2274 = vmatprep.subr.mxu1 %v3812_v5  ;;  %2345 = vmatprep.subr.mxu0 %v3815_v6 }
 0x871   :  { %2275 = vmatpush1.msra.mxu1 %v3818_v8  ;;  %2346 = vmatpush1.msra.mxu0 %v3821_v9 }
 0x872   :  { %2276 = vmatprep.subr.mxu1 %v4226_v16  ;;  %2347 = vmatprep.subr.mxu0 %v4227_v15 }
 0x873   :  { %2277 = vmatpush1.msra.mxu1 %v4228_v27  ;;  %2348 = vmatpush1.msra.mxu0 %v4229_v25 }
 0x874   :  { %2278 = vmatprep.subr.mxu1 %v4230_v14  ;;  %2349 = vmatprep.subr.mxu0 %v4231_v19 }
 0x875   :  { %2279 = vmatpush1.msra.mxu1 %v4232_v7  ;;  %2350 = vmatpush1.msra.mxu0 %v4233_v23 }
 0x876   :  { %2280 = vmatprep.subr.mxu1 %v4234_v20  ;;  %2351 = vmatprep.subr.mxu0 %v4235_v30 }
 0x877   :  { %2281 = vmatpush1.msra.mxu1 %v4236_v33  ;;  %2352 = vmatpush1.msra.mxu0 %v4237_v26 }
 0x878   :  { %2282 = vmatprep.subr.mxu1 %v4238_v32  ;;  %2353 = vmatprep.subr.mxu0 %v4239_v48 }
 0x879   :  { %2283 = vmatpush1.msra.mxu1 %v4240_v18  ;;  %2354 = vmatpush1.msra.mxu0 %v4241_v17 }
 0x87a   :  { %2284 = vmatprep.subr.mxu1 %v4242_v28  ;;  %2355 = vmatprep.subr.mxu0 %v4243_v24 }
 0x87b   :  { %2285 = vmatpush1.msra.mxu1 %v4244_v4  ;;  %2318 = vmatprep.mubr.f32.mxu1 %v4245_v40 }
 0x87c   :  { %2356 = vmatpush1.msra.mxu0 %v4246_v45  ;;  %2389 = vmatprep.mubr.f32.mxu0 %v4245_v40 }
 0x91c   :  { %v2130_v47 = vpop.f32.mrf.mxu1  ;;  %v2201_v49 = vpop.f32.mrf.mxu0 }
 0x91d   :  { %v2210_v50 = vrot.slane %v2130_v47, 4  ;;  %v2212_v22 = vrot.slane %v2201_v49, 4 }
 0x91e   :  { %v2132_v51 = vpop.f32.mrf.mxu1  ;;  %v2203_v46 = vpop.f32.mrf.mxu0 }
 0x91f   :  { %v2218_v31 = vadd.f32 %v2210_v50, %v4247_v52  ;;  %v2211_v21 = vrot.slane %v2132_v51, 4  ;;  %v2213_v29 = vrot.slane %v2203_v46, 4  ;;  %v2220_v62 = vadd.f32 %v2212_v22, %v4202_v61 }
 0x921   :  { %v2219_v54 = vadd.f32 %v2211_v21, %v4203_v53  ;;  %v2221_v56 = vadd.f32 %v2213_v29, %v4204_v2  ;;  %v2223_v59 = vrot.slane %v2218_v31, 4 }
 0x923   :  { %v2226_v60 = vrot.slane %v2219_v54, 2  ;;  %v2229_v0 = vrot.slane %v2221_v56, 6 }
 0x925   :  { %v2231_v63 = vsel %vm71_vm0, %v2223_v59, %v2226_v60 }
 0x926   :  { %v2232_v1 = vsel %vm161_vm3, %v2231_v63, %v2220_v62 }
 0x927   :  { %v2233_v3 = vsel %vm115_vm1, %v2232_v1, %v2229_v0 }
 0x928   :  { %2691 = vtanh.f32 %v2233_v3 }
 0x935   :  { %v2692_v5 = vpop.eup %2691 }
 0x936   :  { %v2235_v6 = vmul.f32 0.5, %v2692_v5  ;;  %v2239_v8 = vrot.slane %v2692_v5, 6 }
 0x938   :  { %v2236_v9 = vadd.f32 0.5, %v2235_v6 }
 0x93a   :  { %v2241_v10 = vmul.f32 %v2239_v8, %v2236_v9  ;;  %v2237_v11 = vmul.f32 %v2236_v9, %v3896_v43 }
 0x93c   :  { %v2243_v44 = vrot.slane %v2241_v10, 6 }
 0x93e   :  { %v2245_v57 = vadd.f32 %v2243_v44, %v2237_v11 }
 0x940   :  { %2693 = vtanh.f32 %v2245_v57 }
 0x94d   :  { %v2694_v58 = vpop.eup %2693 }
 0x94e   :  { %v2248_v41 = vrot.slane %v2694_v58, 6 }
 0x950   :  { %v2250_v39 = vmul.f32 %v2248_v41, %v2236_v9 }
 0x952   :  { %v2252_v38 = vrot.slane %v2250_v39, 4 }
 0x954   :  { %2319 = vmatmul.mubr.f32.vlgmr.msra.gmra.mxu1 %v2252_v38  ;;  %2390 = vmatmul.mubr.f32.vlgmr.msra.gmra.mxu0 %v2252_v38 }
 0xa14   :  { %v2320_v42 = vpop.f32.mrf.mxu1  ;;  %v2391_v37 = vpop.f32.mrf.mxu0 }
 0xa15   :  { %v2400_v36 = vrot.slane %v2320_v42, 2  ;;  %v2402_v35 = vrot.slane %v2391_v37, 2 }
 0xa16   :  { %v2322_v13 = vpop.f32.mrf.mxu1  ;;  %v2393_v55 = vpop.f32.mrf.mxu0 }
 0xa17   :  { %v2408_v12 = vadd.f32 %v2400_v36, %v4247_v52  ;;  %v2401_v34 = vrot.slane %v2322_v13, 2  ;;  %v2410_v43 = vadd.f32 %v2402_v35, %v4202_v61  ;;  %v2403_v15 = vrot.slane %v2393_v55, 2 }
 0xa19   :  { %v2409_v16 = vadd.f32 %v2401_v34, %v4203_v53  ;;  %v2413_v27 = vrot.slane %v2408_v12, 6  ;;  %v2419_v14 = vrot.slane %v2410_v43, 2  ;;  %v2411_v7 = vadd.f32 %v2403_v15, %v4204_v2 }
 0xa1b   :  { %v2416_v25 = vrot.slane %v2409_v16, 4 }
 0xa1d   :  { %v2421_v19 = vsel %vm71_vm0, %v2413_v27, %v2416_v25 }
 0xa1e   :  { %v2422_v23 = vsel %vm161_vm3, %v2421_v19, %v2419_v14 }
 0xa1f   :  { %v2423_v20 = vsel %vm115_vm1, %v2422_v23, %v2411_v7 }
 0xa20   :  { %2695 = vtanh.f32 %v2423_v20 }
 0xa2d   :  { %v2696_v30 = vpop.eup %2695 }
 0xa2e   :  { %v2425_v33 = vmul.f32 0.5, %v2696_v30  ;;  %v2429_v32 = vrot.slane %v2696_v30, 6 }
 0xa30   :  { %v2426_v26 = vadd.f32 0.5, %v2425_v33 }
 0xa32   :  { %v2431_v61 = vmul.f32 %v2429_v32, %v2426_v26  ;;  %v2427_v48 = vmul.f32 %v2426_v26, %v2245_v57 }
 0xa34   :  { %v2433_v53 = vrot.slane %v2431_v61, 6 }
 0xa36   :  { %v2435_v18 = vadd.f32 %v2433_v53, %v2427_v48 }
 0xa38   :  { %2697 = vtanh.f32 %v2435_v18 }
 0xa45   :  { %v2698_v17 = vpop.eup %2697 }
 0xa46   :  { %v2438_v28 = vrot.slane %v2698_v17, 6 }
 0xa48   :  { %v2440_v24 = vmul.f32 %v2438_v28, %v2426_v26 }
 0xa49   :  { %2847 = dma.done.wait [#allocation4 + $0x1], 2048 }
 0xa4a   :  { %2848 = vsyncadd [#allocation4 + $0x1], 4294965248  ;;  %2618 = vmatprep.subr.mxu1 %v4245_v40  ;;  %vm2863_vm0 = vmmov 0   ;;  %v2459_v2 = vld [vmem:[#allocation3 + $0x78] sm:$0xff]  ;;  %v2458_v4 = vld [vmem:[#allocation3 + $0x70] sm:$0xff]  ;;  %v2468_v60 = vrot.slane %v2440_v24, 4 }
 0xa4b   :  { %2650 = vmatprep.mubr.msk.f32.mxu1 %vm2863_vm0, %v4245_v40  ;;  %2619 = vmatpush3.msra.mxu1 %v2459_v2  ;;  %v2457_v45 = vld [vmem:[#allocation3 + $0x68] sm:$0xff]  ;;  %v2456_v47 = vld [vmem:[#allocation3 + $0x60] sm:$0xff]  ;;  %v2455_v49 = vld [vmem:[#allocation3 + $0x58] sm:$0xff]  ;;  %s2864_s6 = smov [#allocation8]  }
 0xa4c   :  { %2620 = vmatprep.subr.mxu1 %v4245_v40  ;;  %v2454_v50 = vld [vmem:[#allocation3 + $0x50] sm:$0xff]  ;;  %v2453_v51 = vld [vmem:[#allocation3 + $0x48] sm:$0xff]  ;;  %v2452_v46 = vld [vmem:[#allocation3 + $0x40] sm:$0xff]  ;;  %s2547_s3 = sshll.u32 %s2864_s6, 4  ;;  %s2548_s3 = int_to_ptr.vmem [resolvable:$true] %s2547_s3 }
 0xa4d   :  { %2621 = vmatpush3.msra.mxu1 %v2458_v4  ;;  %v2451_v52 = vld [vmem:[#allocation3 + $0x38] sm:$0xff]  ;;  %v2450_v31 = vld [vmem:[#allocation3 + $0x30] sm:$0xff]  ;;  %v2449_v21 = vld [vmem:[#allocation3 + $0x28] sm:$0xff]  ;;  %s2823_s18 = scalar_lea.vmem %s2548_s3, 32  ;;  %p2828_p2 = scmp.lt.s32.totalorder %s2548_s3, %s2548_s3 }
 0xa4e   :  { %2622 = vmatprep.subr.mxu1 %v4245_v40  ;;  %v2448_v29 = vld [vmem:[#allocation3 + $0x20] sm:$0xff]  ;;  %v2447_v22 = vld [vmem:[#allocation3 + $0x18] sm:$0xff]  ;;  %v2446_v54 = vld [vmem:[#allocation3 + $0x10] sm:$0xff]  ;;  %p2824_p1 = scmp.ne.s32.totalorder %s2548_s3, %s2823_s18  ;;  %p2829_p3 = scmp.lt.s32.totalorder %s2823_s18, %s2823_s18 }
 0xa4f   :  { %2623 = vmatpush3.msra.mxu1 %v2457_v45  ;;  %v2445_v56 = vld [vmem:[#allocation3 + $0x8] sm:$0xff]  ;;  %v2444_v59 = vld [vmem:[#allocation3] sm:$0xff] }
 0xa50   :  { %2624 = vmatprep.subr.mxu1 %v4245_v40  ;;  %v2579_v62 = vld [vmem:[%s4008_s7] ss:$0 sm:$0xff]  ;;  %p2830_p4 = por %p2829_p3, %p2828_p2 }
 0xa51   :  { %2625 = vmatpush3.msra.mxu1 %v2456_v47 }
 0xa52   :  { %2626 = vmatprep.subr.mxu1 %v4245_v40  ;;  %p2831_p5 = pnand %p2830_p4, %p2824_p1 }
 0xa53   :  { %2627 = vmatpush3.msra.mxu1 %v2455_v49 }
 0xa54   :  { %2628 = vmatprep.subr.mxu1 %v4245_v40 }
 0xa55   :  { %2629 = vmatpush3.msra.mxu1 %v2454_v50 }
 0xa56   :  { %2630 = vmatprep.subr.mxu1 %v4245_v40 }
 0xa57   :  { %2631 = vmatpush3.msra.mxu1 %v2453_v51 }
 0xa58   :  { %2632 = vmatprep.subr.mxu1 %v4245_v40 }
 0xa59   :  { %2633 = vmatpush3.msra.mxu1 %v2452_v46 }
 0xa5a   :  { %2634 = vmatprep.subr.mxu1 %v4245_v40 }
 0xa5b   :  { %2635 = vmatpush3.msra.mxu1 %v2451_v52 }
 0xa5c   :  { %2636 = vmatprep.subr.mxu1 %v4245_v40 }
 0xa5d   :  { %2637 = vmatpush3.msra.mxu1 %v2450_v31 }
 0xa5e   :  { %2638 = vmatprep.subr.mxu1 %v4245_v40 }
 0xa5f   :  { %2639 = vmatpush3.msra.mxu1 %v2449_v21 }
 0xa60   :  { %2640 = vmatprep.subr.mxu1 %v4245_v40 }
 0xa61   :  { %2641 = vmatpush3.msra.mxu1 %v2448_v29 }
 0xa62   :  { %2642 = vmatprep.subr.mxu1 %v4245_v40 }
 0xa63   :  { %2643 = vmatpush3.msra.mxu1 %v2447_v22 }
 0xa64   :  { %2644 = vmatprep.subr.mxu1 %v4245_v40 }
 0xa65   :  { %2645 = vmatpush3.msra.mxu1 %v2446_v54 }
 0xa66   :  { %2646 = vmatprep.subr.mxu1 %v4245_v40 }
 0xa67   :  { %2647 = vmatpush3.msra.mxu1 %v2445_v56 }
 0xa68   :  { %2648 = vmatprep.subr.mxu1 %v4245_v40 }
 0xa69   :  { %2649 = vmatpush3.msra.mxu1 %v2444_v59 }
 0xa6a   :  { %2651 = vmatmul.mubr.f32.vlgmr.msra.gmra.mxu1 %v2468_v60 }
 0xb2a   :  { %v2536_v63 = vpop.f32.mrf.mxu1 }
 0xb2b   :  { %v2537_v0 = vadd.f32 %v2579_v62, %v2536_v63 }
 0xb2c   :  { %v2652_v1 = vpop.f32.mrf.mxu1 }
 0xb2d   :  { %2540 = vst [vmem:[#allocation8] sm:$0x3] %v2537_v0 }
 0xb2e   :  { %2834 = shalt.err (!%p2831_p5)
}
 0xb2f   :  { %2550 = dma.vmem_to_hbm [thread:$0]  %s2548_s3, 32, %s4009_s8, [#allocation7]  }
 0xb30   :  { %2849 = dma.done.wait [#allocation7], 32  }
 0xb31   :  { %2850 = vsyncadd [#allocation7], 4294967264 }
 0xb32   :  { %2554 = vsyncpa [#allocation6], 1 }
 0xb33   :  { %2555 = vsyncpa [#allocation7], 1 }
 0xb34   :  { %2556 = vsyncmov [#allocation4] }
 0xb37   :  { %s2557_s7 = vpop.sfrf %2556 }
 0xb38   :  { %p2580_p6 = scmp.ne.s32.totalorder %s2557_s7, 0 }
 0xb3a   :  { %2561 = shalt.err (%p2580_p6)  }
 0xb3b   :  { %2563 = vsyncmov [#allocation4 + $0x1] }
 0xb3e   :  { %s2564_s0 = vpop.sfrf %2563 }
 0xb3f   :  { %p2581_p7 = scmp.ne.s32.totalorder %s2564_s0, 0 }
 0xb41   :  { %2568 = shalt.err (%p2581_p7)  }

</bundles_post_ra>
